<compile_context>
chip_gen: v7x
topology: tpu7x:2x2x1
jax: 0.10.0
libtpu: 0.0.40
codegen_flags: <defaults>
</compile_context>

<pallas_src>
import functools

import jax
import jax.numpy as jnp
import numpy as np
from jax.experimental import pallas as pl
from jax.experimental.pallas import tpu as pltpu


# ----------------------------------------------------------------------------
# Fused kernel (one image per grid step):
#   maxpool(2) -> conv3x3+bias+ReLU -> conv3x3+bias+ReLU
# ----------------------------------------------------------------------------
def _down_kernel(x_ref, w1_ref, b1_ref, w2_ref, b2_ref, o_ref, pad_ref,
                 *, HO, WO, C_IN, C_MID, C_OUT):
    M = HO * WO

    # Zero the halo scratch. Only the interior is ever written below, so the
    # 1-pixel zero border (== Conv2d padding=1) persists for both convs.
    pad_ref[...] = jnp.zeros_like(pad_ref)

    # ---- fused 2x2 max-pool (pure VPU; pooled map never touches HBM) -------
    # x_ref: (1, HO, 2, WO, 2*C_IN) — a free reshape of NHWC done in wrapper.
    xw = x_ref[0]                                           # (HO, 2, WO, 2*C_IN)
    xh = jnp.maximum(xw[:, 0], xw[:, 1])                    # max over H pair
    pooled = jnp.maximum(xh[..., :C_IN], xh[..., C_IN:])    # max over W pair
    pad_ref[1:HO + 1, 1:WO + 1, :C_IN] = pooled.astype(pad_ref.dtype)

    def conv3x3(w_ref, cin, cout):
        # Zero-padded 3x3 conv = 9 accumulated MXU matmuls on shifted views of
        # the halo buffer (no materialized im2col patch buffer, no strided
        # lane-sparse patch stores). BN scale is pre-folded into the weights.
        acc = jnp.zeros((M, cout), jnp.float32)
        for dy in range(3):
            for dx in range(3):
                t = dy * 3 + dx
                tap = pad_ref[dy:dy + HO, dx:dx + WO, :cin].reshape(M, cin)
                acc += jnp.dot(tap, w_ref[t],
                               preferred_element_type=jnp.float32)
        return acc                                           # (M, cout) f32

    # conv1 + folded-BN bias + ReLU; result re-enters the same halo buffer
    # (border stays zero, interior overwritten) as bf16 MXU operand for conv2.
    h1 = jnp.maximum(conv3x3(w1_ref, C_IN, C_MID) + b1_ref[...], 0.0)
    pad_ref[1:HO + 1, 1:WO + 1, :C_MID] = (
        h1.reshape(HO, WO, C_MID).astype(pad_ref.dtype))

    # conv2 + folded-BN bias + ReLU.
    h2 = jnp.maximum(conv3x3(w2_ref, C_MID, C_OUT) + b2_ref[...], 0.0)

    # ONE 2-D transpose (single XLU pass) to a channel-major (C_OUT, HO*WO)
    # tile; the wrapper recovers NCHW with a free reshape.
    o_ref[0] = h2.T.astype(o_ref.dtype)


# ----------------------------------------------------------------------------
# Wrapper (NCHW in / NCHW out; all glue is free reshapes except the input
# NCHW->NHWC transpose, which is boundary layout plumbing).
# ----------------------------------------------------------------------------
@jax.jit
def down_forward(x_nchw, params):
    n, c_in, h, w = x_nchw.shape
    ho, wo = h // 2, w // 2
    # nn.MaxPool2d(2) floors: crop trailing odd row/col (no-op for even H, W).
    x_nchw = x_nchw[:, :, :2 * ho, :2 * wo]

    c_mid = params["w1"].shape[-1]
    c_out = params["w2"].shape[-1]
    c_max = max(c_in, c_mid)

    # NCHW -> NHWC, then a free contiguous reshape exposing the 2x2 pool pairs.
    x = jnp.transpose(x_nchw, (0, 2, 3, 1)).reshape(n, ho, 2, wo, 2 * c_in)

    # bf16 MXU operands (v6e/v7x bf16-native); BN scale already folded in.
    w1 = params["w1"].reshape(9, c_in, c_mid).astype(jnp.bfloat16)
    w2 = params["w2"].reshape(9, c_mid, c_out).astype(jnp.bfloat16)
    b1 = params["b1"].reshape(1, c_mid).astype(jnp.float32)
    b2 = params["b2"].reshape(1, c_out).astype(jnp.float32)

    kernel = functools.partial(_down_kernel, HO=ho, WO=wo,
                               C_IN=c_in, C_MID=c_mid, C_OUT=c_out)

    out = pl.pallas_call(
        kernel,
        out_shape=jax.ShapeDtypeStruct((n, c_out, ho * wo), x_nchw.dtype),
        grid=(n,),
        in_specs=[
            pl.BlockSpec((1, ho, 2, wo, 2 * c_in), lambda i: (i, 0, 0, 0, 0)),
            pl.BlockSpec((9, c_in, c_mid), lambda i: (0, 0, 0)),
            pl.BlockSpec((1, c_mid), lambda i: (0, 0)),
            pl.BlockSpec((9, c_mid, c_out), lambda i: (0, 0, 0)),
            pl.BlockSpec((1, c_out), lambda i: (0, 0)),
        ],
        out_specs=pl.BlockSpec((1, c_out, ho * wo), lambda i: (i, 0, 0)),
        scratch_shapes=[
            # Single halo'd activation buffer, shared by both convs (bf16).
            pltpu.VMEM((ho + 2, wo + 2, c_max), jnp.bfloat16),
        ],
        compiler_params=pltpu.CompilerParams(
            dimension_semantics=("parallel",),          # v7x: 2 TCs share batch
            vmem_limit_bytes=48 * 1024 * 1024),
    )(x, w1, b1, w2, b2)

    # Free contiguous reshape back to NCHW (data is already channel-major).
    return out.reshape(n, c_out, ho, wo)


# ----------------------------------------------------------------------------
# Parameter construction (PyTorch-style init, BN folded for eval semantics).
# ----------------------------------------------------------------------------
def make_down_params(key, in_channels, out_channels):
    mid_channels = out_channels
    eps = 1e-5
    k1, k2, k3, k4, k5, k6 = jax.random.split(key, 6)

    def conv_w(k, cin, cout):
        # PyTorch layout (Cout, Cin, 3, 3) -> HWIO (3, 3, Cin, Cout)
        wt = 0.1 * jax.random.normal(k, (cout, cin, 3, 3), jnp.float32)
        return jnp.transpose(wt, (2, 3, 1, 0))

    def bn_fold(kg, kb, c):
        gamma = 1.0 + 0.1 * jax.random.normal(kg, (c,), jnp.float32)
        beta = 0.1 * jax.random.normal(kb, (c,), jnp.float32)
        running_mean = jnp.zeros((c,), jnp.float32)
        running_var = jnp.ones((c,), jnp.float32)
        scale = gamma / jnp.sqrt(running_var + eps)
        bias = beta - running_mean * scale
        return scale, bias

    w1 = conv_w(k1, in_channels, mid_channels)
    s1, b1 = bn_fold(k2, k3, mid_channels)
    w2 = conv_w(k4, mid_channels, out_channels)
    s2, b2 = bn_fold(k5, k6, out_channels)
    # Fold the per-output-channel BN scale into the conv weights so the kernel
    # only adds the bias after the matmul.
    w1 = w1 * s1[None, None, None, :]
    w2 = w2 * s2[None, None, None, :]
    return dict(w1=w1, b1=b1, w2=w2, b2=b2)


# ----------------------------------------------------------------------------
# Pure-JAX reference (for correctness verification; f32 throughout).
# ----------------------------------------------------------------------------
def down_forward_reference(x_nchw, params):
    x = jax.lax.reduce_window(x_nchw, -jnp.inf, jax.lax.max,
                              window_dimensions=(1, 1, 2, 2),
                              window_strides=(1, 1, 2, 2), padding="VALID")

    def conv_bias_relu(xx, w_hwio, b):
        y = jax.lax.conv_general_dilated(
            xx, w_hwio, window_strides=(1, 1), padding="SAME",
            dimension_numbers=("NCHW", "HWIO", "NCHW"))
        return jax.nn.relu(y + b[None, :, None, None])

    x = conv_bias_relu(x, params["w1"], params["b1"])
    x = conv_bias_relu(x, params["w2"], params["b2"])
    return x


if __name__ == "__main__":
    key = jax.random.PRNGKey(0)
    k_x, k_p = jax.random.split(key)

    N, C_IN, C_OUT, HW = 2, 4, 8, 16
    x = jax.random.normal(k_x, (N, C_IN, HW, HW), jnp.float32)
    params = make_down_params(k_p, C_IN, C_OUT)

    y = jax.block_until_ready(down_forward(x, params))

    assert y.shape == (N, C_OUT, HW // 2, HW // 2), y.shape
    assert y.dtype == jnp.float32

    y_ref = jax.block_until_ready(down_forward_reference(x, params))
    # bf16 MXU operands vs. f32 reference -> bf16-level tolerance.
    np.testing.assert_allclose(np.asarray(y), np.asarray(y_ref),
                               rtol=3e-2, atol=3e-2)

    print("KERNEL_OK")
</pallas_src>

<mosaic_0001>
module attributes {stable_mosaic.version = 11 : i64} {
  func.func @_down_kernel(%arg0: i32, %arg1: memref<1x8x2x8x8xf32, #tpu.memory_space<vmem>>, %arg2: memref<9x4x8xbf16, #tpu.memory_space<vmem>>, %arg3: memref<1x8xf32, #tpu.memory_space<vmem>>, %arg4: memref<9x8x8xbf16, #tpu.memory_space<vmem>>, %arg5: memref<1x8xf32, #tpu.memory_space<vmem>>, %arg6: memref<1x8x64xf32, #tpu.memory_space<vmem>>, %arg7: memref<10x10x8xbf16, #tpu.memory_space<vmem>>) attributes {dimension_semantics = [#tpu.dimension_semantics<parallel>], iteration_bounds = array<i64: 2>, scalar_prefetch = 0 : i64, scratch_operands = 1 : i64, tpu.core_type = #tpu.core_type<tc>, window_params = [{transform_indices = @transform_0, window_bounds = array<i64: 1, 8, 2, 8, 8>}, {pipeline_mode = #tpu.pipeline_mode<synchronous>, transform_indices = @transform_1, window_bounds = array<i64: 9, 4, 8>}, {pipeline_mode = #tpu.pipeline_mode<synchronous>, transform_indices = @transform_2, window_bounds = array<i64: 1, 8>}, {pipeline_mode = #tpu.pipeline_mode<synchronous>, transform_indices = @transform_3, window_bounds = array<i64: 9, 8, 8>}, {pipeline_mode = #tpu.pipeline_mode<synchronous>, transform_indices = @transform_4, window_bounds = array<i64: 1, 8>}, {transform_indices = @transform_5, window_bounds = array<i64: 1, 8, 64>}]} {
    %cst = arith.constant 0.000000e+00 : bf16
    %0 = vector.broadcast %cst : bf16 to vector<10x10x8xbf16>
    %c0 = arith.constant 0 : index
    %c0_0 = arith.constant 0 : index
    %c0_1 = arith.constant 0 : index
    %1 = vector.load %arg7[%c0, %c0_0, %c0_1] : memref<10x10x8xbf16, #tpu.memory_space<vmem>>, vector<10x10x8xbf16>
    tpu.vector_store %arg7[%c0, %c0_0, %c0_1], %0 {strides = array<i32>} : memref<10x10x8xbf16, #tpu.memory_space<vmem>>, vector<10x10x8xbf16>,
    %c0_2 = arith.constant 0 : index
    %c0_3 = arith.constant 0 : index
    %c0_4 = arith.constant 0 : index
    %c0_5 = arith.constant 0 : index
    %c0_6 = arith.constant 0 : index
    %2 = vector.load %arg1[%c0_2, %c0_3, %c0_4, %c0_5, %c0_6] : memref<1x8x2x8x8xf32, #tpu.memory_space<vmem>>, vector<1x8x2x8x8xf32>
    %3 = vector.shape_cast %2 : vector<1x8x2x8x8xf32> to vector<8x2x8x8xf32>
    %4 = vector.extract_strided_slice %3 {offsets = [0, 0, 0, 0], sizes = [8, 1, 8, 8], strides = [1, 1, 1, 1]} : vector<8x2x8x8xf32> to vector<8x1x8x8xf32>
    %5 = vector.shape_cast %4 : vector<8x1x8x8xf32> to vector<8x8x8xf32>
    %6 = vector.extract_strided_slice %3 {offsets = [0, 1, 0, 0], sizes = [8, 1, 8, 8], strides = [1, 1, 1, 1]} : vector<8x2x8x8xf32> to vector<8x1x8x8xf32>
    %7 = vector.shape_cast %6 : vector<8x1x8x8xf32> to vector<8x8x8xf32>
    %8 = arith.maximumf %5, %7 : vector<8x8x8xf32>
    %9 = vector.extract_strided_slice %8 {offsets = [0, 0, 0], sizes = [8, 8, 4], strides = [1, 1, 1]} : vector<8x8x8xf32> to vector<8x8x4xf32>
    %10 = vector.extract_strided_slice %8 {offsets = [0, 0, 4], sizes = [8, 8, 4], strides = [1, 1, 1]} : vector<8x8x8xf32> to vector<8x8x4xf32>
    %11 = arith.maximumf %9, %10 : vector<8x8x4xf32>
    %12 = arith.truncf %11 : vector<8x8x4xf32> to vector<8x8x4xbf16>
    %c1 = arith.constant 1 : index
    %c1_7 = arith.constant 1 : index
    %c0_8 = arith.constant 0 : index
    %13 = vector.load %arg7[%c1, %c1_7, %c0_8] : memref<10x10x8xbf16, #tpu.memory_space<vmem>>, vector<8x8x4xbf16>
    tpu.vector_store %arg7[%c1, %c1_7, %c0_8], %12 {strides = array<i32>} : memref<10x10x8xbf16, #tpu.memory_space<vmem>>, vector<8x8x4xbf16>,
    %cst_9 = arith.constant 0.000000e+00 : f32
    %14 = vector.broadcast %cst_9 : f32 to vector<64x8xf32>
    %c0_10 = arith.constant 0 : index
    %c0_11 = arith.constant 0 : index
    %c0_12 = arith.constant 0 : index
    %15 = vector.load %arg7[%c0_10, %c0_11, %c0_12] : memref<10x10x8xbf16, #tpu.memory_space<vmem>>, vector<8x8x4xbf16>
    %16 = vector.shape_cast %15 : vector<8x8x4xbf16> to vector<64x4xbf16>
    %c0_13 = arith.constant 0 : index
    %c0_14 = arith.constant 0 : index
    %c0_15 = arith.constant 0 : index
    %17 = vector.load %arg2[%c0_13, %c0_14, %c0_15] : memref<9x4x8xbf16, #tpu.memory_space<vmem>>, vector<1x4x8xbf16>
    %18 = vector.shape_cast %17 : vector<1x4x8xbf16> to vector<4x8xbf16>
    %cst_16 = arith.constant dense<0.000000e+00> : vector<64x8xf32>
    %19 = tpu.matmul %16, %18, %cst_16 {dimension_numbers = #tpu.dot_dimension_numbers<[1], [0], [0], [1], [0, 0, 1, 1], [], []>} : vector<64x4xbf16>, vector<4x8xbf16>, vector<64x8xf32> -> vector<64x8xf32>
    %20 = arith.addf %14, %19 : vector<64x8xf32>
    %c0_17 = arith.constant 0 : index
    %c1_18 = arith.constant 1 : index
    %c0_19 = arith.constant 0 : index
    %21 = vector.load %arg7[%c0_17, %c1_18, %c0_19] : memref<10x10x8xbf16, #tpu.memory_space<vmem>>, vector<8x8x4xbf16>
    %22 = vector.shape_cast %21 : vector<8x8x4xbf16> to vector<64x4xbf16>
    %c1_20 = arith.constant 1 : index
    %c0_21 = arith.constant 0 : index
    %c0_22 = arith.constant 0 : index
    %23 = vector.load %arg2[%c1_20, %c0_21, %c0_22] : memref<9x4x8xbf16, #tpu.memory_space<vmem>>, vector<1x4x8xbf16>
    %24 = vector.shape_cast %23 : vector<1x4x8xbf16> to vector<4x8xbf16>
    %cst_23 = arith.constant dense<0.000000e+00> : vector<64x8xf32>
    %25 = tpu.matmul %22, %24, %cst_23 {dimension_numbers = #tpu.dot_dimension_numbers<[1], [0], [0], [1], [0, 0, 1, 1], [], []>} : vector<64x4xbf16>, vector<4x8xbf16>, vector<64x8xf32> -> vector<64x8xf32>
    %26 = arith.addf %20, %25 : vector<64x8xf32>
    %c0_24 = arith.constant 0 : index
    %c2 = arith.constant 2 : index
    %c0_25 = arith.constant 0 : index
    %27 = vector.load %arg7[%c0_24, %c2, %c0_25] : memref<10x10x8xbf16, #tpu.memory_space<vmem>>, vector<8x8x4xbf16>
    %28 = vector.shape_cast %27 : vector<8x8x4xbf16> to vector<64x4xbf16>
    %c2_26 = arith.constant 2 : index
    %c0_27 = arith.constant 0 : index
    %c0_28 = arith.constant 0 : index
    %29 = vector.load %arg2[%c2_26, %c0_27, %c0_28] : memref<9x4x8xbf16, #tpu.memory_space<vmem>>, vector<1x4x8xbf16>
    %30 = vector.shape_cast %29 : vector<1x4x8xbf16> to vector<4x8xbf16>
    %cst_29 = arith.constant dense<0.000000e+00> : vector<64x8xf32>
    %31 = tpu.matmul %28, %30, %cst_29 {dimension_numbers = #tpu.dot_dimension_numbers<[1], [0], [0], [1], [0, 0, 1, 1], [], []>} : vector<64x4xbf16>, vector<4x8xbf16>, vector<64x8xf32> -> vector<64x8xf32>
    %32 = arith.addf %26, %31 : vector<64x8xf32>
    %c1_30 = arith.constant 1 : index
    %c0_31 = arith.constant 0 : index
    %c0_32 = arith.constant 0 : index
    %33 = vector.load %arg7[%c1_30, %c0_31, %c0_32] : memref<10x10x8xbf16, #tpu.memory_space<vmem>>, vector<8x8x4xbf16>
    %34 = vector.shape_cast %33 : vector<8x8x4xbf16> to vector<64x4xbf16>
    %c3 = arith.constant 3 : index
    %c0_33 = arith.constant 0 : index
    %c0_34 = arith.constant 0 : index
    %35 = vector.load %arg2[%c3, %c0_33, %c0_34] : memref<9x4x8xbf16, #tpu.memory_space<vmem>>, vector<1x4x8xbf16>
    %36 = vector.shape_cast %35 : vector<1x4x8xbf16> to vector<4x8xbf16>
    %cst_35 = arith.constant dense<0.000000e+00> : vector<64x8xf32>
    %37 = tpu.matmul %34, %36, %cst_35 {dimension_numbers = #tpu.dot_dimension_numbers<[1], [0], [0], [1], [0, 0, 1, 1], [], []>} : vector<64x4xbf16>, vector<4x8xbf16>, vector<64x8xf32> -> vector<64x8xf32>
    %38 = arith.addf %32, %37 : vector<64x8xf32>
    %c1_36 = arith.constant 1 : index
    %c1_37 = arith.constant 1 : index
    %c0_38 = arith.constant 0 : index
    %39 = vector.load %arg7[%c1_36, %c1_37, %c0_38] : memref<10x10x8xbf16, #tpu.memory_space<vmem>>, vector<8x8x4xbf16>
    %40 = vector.shape_cast %39 : vector<8x8x4xbf16> to vector<64x4xbf16>
    %c4 = arith.constant 4 : index
    %c0_39 = arith.constant 0 : index
    %c0_40 = arith.constant 0 : index
    %41 = vector.load %arg2[%c4, %c0_39, %c0_40] : memref<9x4x8xbf16, #tpu.memory_space<vmem>>, vector<1x4x8xbf16>
    %42 = vector.shape_cast %41 : vector<1x4x8xbf16> to vector<4x8xbf16>
    %cst_41 = arith.constant dense<0.000000e+00> : vector<64x8xf32>
    %43 = tpu.matmul %40, %42, %cst_41 {dimension_numbers = #tpu.dot_dimension_numbers<[1], [0], [0], [1], [0, 0, 1, 1], [], []>} : vector<64x4xbf16>, vector<4x8xbf16>, vector<64x8xf32> -> vector<64x8xf32>
    %44 = arith.addf %38, %43 : vector<64x8xf32>
    %c1_42 = arith.constant 1 : index
    %c2_43 = arith.constant 2 : index
    %c0_44 = arith.constant 0 : index
    %45 = vector.load %arg7[%c1_42, %c2_43, %c0_44] : memref<10x10x8xbf16, #tpu.memory_space<vmem>>, vector<8x8x4xbf16>
    %46 = vector.shape_cast %45 : vector<8x8x4xbf16> to vector<64x4xbf16>
    %c5 = arith.constant 5 : index
    %c0_45 = arith.constant 0 : index
    %c0_46 = arith.constant 0 : index
    %47 = vector.load %arg2[%c5, %c0_45, %c0_46] : memref<9x4x8xbf16, #tpu.memory_space<vmem>>, vector<1x4x8xbf16>
    %48 = vector.shape_cast %47 : vector<1x4x8xbf16> to vector<4x8xbf16>
    %cst_47 = arith.constant dense<0.000000e+00> : vector<64x8xf32>
    %49 = tpu.matmul %46, %48, %cst_47 {dimension_numbers = #tpu.dot_dimension_numbers<[1], [0], [0], [1], [0, 0, 1, 1], [], []>} : vector<64x4xbf16>, vector<4x8xbf16>, vector<64x8xf32> -> vector<64x8xf32>
    %50 = arith.addf %44, %49 : vector<64x8xf32>
    %c2_48 = arith.constant 2 : index
    %c0_49 = arith.constant 0 : index
    %c0_50 = arith.constant 0 : index
    %51 = vector.load %arg7[%c2_48, %c0_49, %c0_50] : memref<10x10x8xbf16, #tpu.memory_space<vmem>>, vector<8x8x4xbf16>
    %52 = vector.shape_cast %51 : vector<8x8x4xbf16> to vector<64x4xbf16>
    %c6 = arith.constant 6 : index
    %c0_51 = arith.constant 0 : index
    %c0_52 = arith.constant 0 : index
    %53 = vector.load %arg2[%c6, %c0_51, %c0_52] : memref<9x4x8xbf16, #tpu.memory_space<vmem>>, vector<1x4x8xbf16>
    %54 = vector.shape_cast %53 : vector<1x4x8xbf16> to vector<4x8xbf16>
    %cst_53 = arith.constant dense<0.000000e+00> : vector<64x8xf32>
    %55 = tpu.matmul %52, %54, %cst_53 {dimension_numbers = #tpu.dot_dimension_numbers<[1], [0], [0], [1], [0, 0, 1, 1], [], []>} : vector<64x4xbf16>, vector<4x8xbf16>, vector<64x8xf32> -> vector<64x8xf32>
    %56 = arith.addf %50, %55 : vector<64x8xf32>
    %c2_54 = arith.constant 2 : index
    %c1_55 = arith.constant 1 : index
    %c0_56 = arith.constant 0 : index
    %57 = vector.load %arg7[%c2_54, %c1_55, %c0_56] : memref<10x10x8xbf16, #tpu.memory_space<vmem>>, vector<8x8x4xbf16>
    %58 = vector.shape_cast %57 : vector<8x8x4xbf16> to vector<64x4xbf16>
    %c7 = arith.constant 7 : index
    %c0_57 = arith.constant 0 : index
    %c0_58 = arith.constant 0 : index
    %59 = vector.load %arg2[%c7, %c0_57, %c0_58] : memref<9x4x8xbf16, #tpu.memory_space<vmem>>, vector<1x4x8xbf16>
    %60 = vector.shape_cast %59 : vector<1x4x8xbf16> to vector<4x8xbf16>
    %cst_59 = arith.constant dense<0.000000e+00> : vector<64x8xf32>
    %61 = tpu.matmul %58, %60, %cst_59 {dimension_numbers = #tpu.dot_dimension_numbers<[1], [0], [0], [1], [0, 0, 1, 1], [], []>} : vector<64x4xbf16>, vector<4x8xbf16>, vector<64x8xf32> -> vector<64x8xf32>
    %62 = arith.addf %56, %61 : vector<64x8xf32>
    %c2_60 = arith.constant 2 : index
    %c2_61 = arith.constant 2 : index
    %c0_62 = arith.constant 0 : index
    %63 = vector.load %arg7[%c2_60, %c2_61, %c0_62] : memref<10x10x8xbf16, #tpu.memory_space<vmem>>, vector<8x8x4xbf16>
    %64 = vector.shape_cast %63 : vector<8x8x4xbf16> to vector<64x4xbf16>
    %c8 = arith.constant 8 : index
    %c0_63 = arith.constant 0 : index
    %c0_64 = arith.constant 0 : index
    %65 = vector.load %arg2[%c8, %c0_63, %c0_64] : memref<9x4x8xbf16, #tpu.memory_space<vmem>>, vector<1x4x8xbf16>
    %66 = vector.shape_cast %65 : vector<1x4x8xbf16> to vector<4x8xbf16>
    %cst_65 = arith.constant dense<0.000000e+00> : vector<64x8xf32>
    %67 = tpu.matmul %64, %66, %cst_65 {dimension_numbers = #tpu.dot_dimension_numbers<[1], [0], [0], [1], [0, 0, 1, 1], [], []>} : vector<64x4xbf16>, vector<4x8xbf16>, vector<64x8xf32> -> vector<64x8xf32>
    %68 = arith.addf %62, %67 : vector<64x8xf32>
    %c0_66 = arith.constant 0 : index
    %c0_67 = arith.constant 0 : index
    %69 = vector.load %arg3[%c0_66, %c0_67] : memref<1x8xf32, #tpu.memory_space<vmem>>, vector<1x8xf32>
    %70 = vector.broadcast %69 : vector<1x8xf32> to vector<64x8xf32>
    %71 = arith.addf %68, %70 : vector<64x8xf32>
    %cst_68 = arith.constant 0.000000e+00 : f32
    %72 = vector.broadcast %cst_68 : f32 to vector<64x8xf32>
    %73 = arith.maximumf %71, %72 : vector<64x8xf32>
    %74 = vector.shape_cast %73 : vector<64x8xf32> to vector<8x8x8xf32>
    %75 = arith.truncf %74 : vector<8x8x8xf32> to vector<8x8x8xbf16>
    %c1_69 = arith.constant 1 : index
    %c1_70 = arith.constant 1 : index
    %c0_71 = arith.constant 0 : index
    %76 = vector.load %arg7[%c1_69, %c1_70, %c0_71] : memref<10x10x8xbf16, #tpu.memory_space<vmem>>, vector<8x8x8xbf16>
    tpu.vector_store %arg7[%c1_69, %c1_70, %c0_71], %75 {strides = array<i32>} : memref<10x10x8xbf16, #tpu.memory_space<vmem>>, vector<8x8x8xbf16>,
    %cst_72 = arith.constant 0.000000e+00 : f32
    %77 = vector.broadcast %cst_72 : f32 to vector<64x8xf32>
    %c0_73 = arith.constant 0 : index
    %c0_74 = arith.constant 0 : index
    %c0_75 = arith.constant 0 : index
    %78 = vector.load %arg7[%c0_73, %c0_74, %c0_75] : memref<10x10x8xbf16, #tpu.memory_space<vmem>>, vector<8x8x8xbf16>
    %79 = vector.shape_cast %78 : vector<8x8x8xbf16> to vector<64x8xbf16>
    %c0_76 = arith.constant 0 : index
    %c0_77 = arith.constant 0 : index
    %c0_78 = arith.constant 0 : index
    %80 = vector.load %arg4[%c0_76, %c0_77, %c0_78] : memref<9x8x8xbf16, #tpu.memory_space<vmem>>, vector<1x8x8xbf16>
    %81 = vector.shape_cast %80 : vector<1x8x8xbf16> to vector<8x8xbf16>
    %cst_79 = arith.constant dense<0.000000e+00> : vector<64x8xf32>
    %82 = tpu.matmul %79, %81, %cst_79 {dimension_numbers = #tpu.dot_dimension_numbers<[1], [0], [0], [1], [0, 0, 1, 1], [], []>} : vector<64x8xbf16>, vector<8x8xbf16>, vector<64x8xf32> -> vector<64x8xf32>
    %83 = arith.addf %77, %82 : vector<64x8xf32>
    %c0_80 = arith.constant 0 : index
    %c1_81 = arith.constant 1 : index
    %c0_82 = arith.constant 0 : index
    %84 = vector.load %arg7[%c0_80, %c1_81, %c0_82] : memref<10x10x8xbf16, #tpu.memory_space<vmem>>, vector<8x8x8xbf16>
    %85 = vector.shape_cast %84 : vector<8x8x8xbf16> to vector<64x8xbf16>
    %c1_83 = arith.constant 1 : index
    %c0_84 = arith.constant 0 : index
    %c0_85 = arith.constant 0 : index
    %86 = vector.load %arg4[%c1_83, %c0_84, %c0_85] : memref<9x8x8xbf16, #tpu.memory_space<vmem>>, vector<1x8x8xbf16>
    %87 = vector.shape_cast %86 : vector<1x8x8xbf16> to vector<8x8xbf16>
    %cst_86 = arith.constant dense<0.000000e+00> : vector<64x8xf32>
    %88 = tpu.matmul %85, %87, %cst_86 {dimension_numbers = #tpu.dot_dimension_numbers<[1], [0], [0], [1], [0, 0, 1, 1], [], []>} : vector<64x8xbf16>, vector<8x8xbf16>, vector<64x8xf32> -> vector<64x8xf32>
    %89 = arith.addf %83, %88 : vector<64x8xf32>
    %c0_87 = arith.constant 0 : index
    %c2_88 = arith.constant 2 : index
    %c0_89 = arith.constant 0 : index
    %90 = vector.load %arg7[%c0_87, %c2_88, %c0_89] : memref<10x10x8xbf16, #tpu.memory_space<vmem>>, vector<8x8x8xbf16>
    %91 = vector.shape_cast %90 : vector<8x8x8xbf16> to vector<64x8xbf16>
    %c2_90 = arith.constant 2 : index
    %c0_91 = arith.constant 0 : index
    %c0_92 = arith.constant 0 : index
    %92 = vector.load %arg4[%c2_90, %c0_91, %c0_92] : memref<9x8x8xbf16, #tpu.memory_space<vmem>>, vector<1x8x8xbf16>
    %93 = vector.shape_cast %92 : vector<1x8x8xbf16> to vector<8x8xbf16>
    %cst_93 = arith.constant dense<0.000000e+00> : vector<64x8xf32>
    %94 = tpu.matmul %91, %93, %cst_93 {dimension_numbers = #tpu.dot_dimension_numbers<[1], [0], [0], [1], [0, 0, 1, 1], [], []>} : vector<64x8xbf16>, vector<8x8xbf16>, vector<64x8xf32> -> vector<64x8xf32>
    %95 = arith.addf %89, %94 : vector<64x8xf32>
    %c1_94 = arith.constant 1 : index
    %c0_95 = arith.constant 0 : index
    %c0_96 = arith.constant 0 : index
    %96 = vector.load %arg7[%c1_94, %c0_95, %c0_96] : memref<10x10x8xbf16, #tpu.memory_space<vmem>>, vector<8x8x8xbf16>
    %97 = vector.shape_cast %96 : vector<8x8x8xbf16> to vector<64x8xbf16>
    %c3_97 = arith.constant 3 : index
    %c0_98 = arith.constant 0 : index
    %c0_99 = arith.constant 0 : index
    %98 = vector.load %arg4[%c3_97, %c0_98, %c0_99] : memref<9x8x8xbf16, #tpu.memory_space<vmem>>, vector<1x8x8xbf16>
    %99 = vector.shape_cast %98 : vector<1x8x8xbf16> to vector<8x8xbf16>
    %cst_100 = arith.constant dense<0.000000e+00> : vector<64x8xf32>
    %100 = tpu.matmul %97, %99, %cst_100 {dimension_numbers = #tpu.dot_dimension_numbers<[1], [0], [0], [1], [0, 0, 1, 1], [], []>} : vector<64x8xbf16>, vector<8x8xbf16>, vector<64x8xf32> -> vector<64x8xf32>
    %101 = arith.addf %95, %100 : vector<64x8xf32>
    %c1_101 = arith.constant 1 : index
    %c1_102 = arith.constant 1 : index
    %c0_103 = arith.constant 0 : index
    %102 = vector.load %arg7[%c1_101, %c1_102, %c0_103] : memref<10x10x8xbf16, #tpu.memory_space<vmem>>, vector<8x8x8xbf16>
    %103 = vector.shape_cast %102 : vector<8x8x8xbf16> to vector<64x8xbf16>
    %c4_104 = arith.constant 4 : index
    %c0_105 = arith.constant 0 : index
    %c0_106 = arith.constant 0 : index
    %104 = vector.load %arg4[%c4_104, %c0_105, %c0_106] : memref<9x8x8xbf16, #tpu.memory_space<vmem>>, vector<1x8x8xbf16>
    %105 = vector.shape_cast %104 : vector<1x8x8xbf16> to vector<8x8xbf16>
    %cst_107 = arith.constant dense<0.000000e+00> : vector<64x8xf32>
    %106 = tpu.matmul %103, %105, %cst_107 {dimension_numbers = #tpu.dot_dimension_numbers<[1], [0], [0], [1], [0, 0, 1, 1], [], []>} : vector<64x8xbf16>, vector<8x8xbf16>, vector<64x8xf32> -> vector<64x8xf32>
    %107 = arith.addf %101, %106 : vector<64x8xf32>
    %c1_108 = arith.constant 1 : index
    %c2_109 = arith.constant 2 : index
    %c0_110 = arith.constant 0 : index
    %108 = vector.load %arg7[%c1_108, %c2_109, %c0_110] : memref<10x10x8xbf16, #tpu.memory_space<vmem>>, vector<8x8x8xbf16>
    %109 = vector.shape_cast %108 : vector<8x8x8xbf16> to vector<64x8xbf16>
    %c5_111 = arith.constant 5 : index
    %c0_112 = arith.constant 0 : index
    %c0_113 = arith.constant 0 : index
    %110 = vector.load %arg4[%c5_111, %c0_112, %c0_113] : memref<9x8x8xbf16, #tpu.memory_space<vmem>>, vector<1x8x8xbf16>
    %111 = vector.shape_cast %110 : vector<1x8x8xbf16> to vector<8x8xbf16>
    %cst_114 = arith.constant dense<0.000000e+00> : vector<64x8xf32>
    %112 = tpu.matmul %109, %111, %cst_114 {dimension_numbers = #tpu.dot_dimension_numbers<[1], [0], [0], [1], [0, 0, 1, 1], [], []>} : vector<64x8xbf16>, vector<8x8xbf16>, vector<64x8xf32> -> vector<64x8xf32>
    %113 = arith.addf %107, %112 : vector<64x8xf32>
    %c2_115 = arith.constant 2 : index
    %c0_116 = arith.constant 0 : index
    %c0_117 = arith.constant 0 : index
    %114 = vector.load %arg7[%c2_115, %c0_116, %c0_117] : memref<10x10x8xbf16, #tpu.memory_space<vmem>>, vector<8x8x8xbf16>
    %115 = vector.shape_cast %114 : vector<8x8x8xbf16> to vector<64x8xbf16>
    %c6_118 = arith.constant 6 : index
    %c0_119 = arith.constant 0 : index
    %c0_120 = arith.constant 0 : index
    %116 = vector.load %arg4[%c6_118, %c0_119, %c0_120] : memref<9x8x8xbf16, #tpu.memory_space<vmem>>, vector<1x8x8xbf16>
    %117 = vector.shape_cast %116 : vector<1x8x8xbf16> to vector<8x8xbf16>
    %cst_121 = arith.constant dense<0.000000e+00> : vector<64x8xf32>
    %118 = tpu.matmul %115, %117, %cst_121 {dimension_numbers = #tpu.dot_dimension_numbers<[1], [0], [0], [1], [0, 0, 1, 1], [], []>} : vector<64x8xbf16>, vector<8x8xbf16>, vector<64x8xf32> -> vector<64x8xf32>
    %119 = arith.addf %113, %118 : vector<64x8xf32>
    %c2_122 = arith.constant 2 : index
    %c1_123 = arith.constant 1 : index
    %c0_124 = arith.constant 0 : index
    %120 = vector.load %arg7[%c2_122, %c1_123, %c0_124] : memref<10x10x8xbf16, #tpu.memory_space<vmem>>, vector<8x8x8xbf16>
    %121 = vector.shape_cast %120 : vector<8x8x8xbf16> to vector<64x8xbf16>
    %c7_125 = arith.constant 7 : index
    %c0_126 = arith.constant 0 : index
    %c0_127 = arith.constant 0 : index
    %122 = vector.load %arg4[%c7_125, %c0_126, %c0_127] : memref<9x8x8xbf16, #tpu.memory_space<vmem>>, vector<1x8x8xbf16>
    %123 = vector.shape_cast %122 : vector<1x8x8xbf16> to vector<8x8xbf16>
    %cst_128 = arith.constant dense<0.000000e+00> : vector<64x8xf32>
    %124 = tpu.matmul %121, %123, %cst_128 {dimension_numbers = #tpu.dot_dimension_numbers<[1], [0], [0], [1], [0, 0, 1, 1], [], []>} : vector<64x8xbf16>, vector<8x8xbf16>, vector<64x8xf32> -> vector<64x8xf32>
    %125 = arith.addf %119, %124 : vector<64x8xf32>
    %c2_129 = arith.constant 2 : index
    %c2_130 = arith.constant 2 : index
    %c0_131 = arith.constant 0 : index
    %126 = vector.load %arg7[%c2_129, %c2_130, %c0_131] : memref<10x10x8xbf16, #tpu.memory_space<vmem>>, vector<8x8x8xbf16>
    %127 = vector.shape_cast %126 : vector<8x8x8xbf16> to vector<64x8xbf16>
    %c8_132 = arith.constant 8 : index
    %c0_133 = arith.constant 0 : index
    %c0_134 = arith.constant 0 : index
    %128 = vector.load %arg4[%c8_132, %c0_133, %c0_134] : memref<9x8x8xbf16, #tpu.memory_space<vmem>>, vector<1x8x8xbf16>
    %129 = vector.shape_cast %128 : vector<1x8x8xbf16> to vector<8x8xbf16>
    %cst_135 = arith.constant dense<0.000000e+00> : vector<64x8xf32>
    %130 = tpu.matmul %127, %129, %cst_135 {dimension_numbers = #tpu.dot_dimension_numbers<[1], [0], [0], [1], [0, 0, 1, 1], [], []>} : vector<64x8xbf16>, vector<8x8xbf16>, vector<64x8xf32> -> vector<64x8xf32>
    %131 = arith.addf %125, %130 : vector<64x8xf32>
    %c0_136 = arith.constant 0 : index
    %c0_137 = arith.constant 0 : index
    %132 = vector.load %arg5[%c0_136, %c0_137] : memref<1x8xf32, #tpu.memory_space<vmem>>, vector<1x8xf32>
    %133 = vector.broadcast %132 : vector<1x8xf32> to vector<64x8xf32>
    %134 = arith.addf %131, %133 : vector<64x8xf32>
    %cst_138 = arith.constant 0.000000e+00 : f32
    %135 = vector.broadcast %cst_138 : f32 to vector<64x8xf32>
    %136 = arith.maximumf %134, %135 : vector<64x8xf32>
    %137 = tpu.transpose %136, [1, 0] : vector<64x8xf32> -> vector<8x64xf32>
    %c0_139 = arith.constant 0 : index
    %c0_140 = arith.constant 0 : index
    %c0_141 = arith.constant 0 : index
    %138 = vector.load %arg6[%c0_139, %c0_140, %c0_141] : memref<1x8x64xf32, #tpu.memory_space<vmem>>, vector<1x8x64xf32>
    %139 = vector.shape_cast %138 : vector<1x8x64xf32> to vector<8x64xf32>
    %140 = vector.shape_cast %137 : vector<8x64xf32> to vector<1x8x64xf32>
    tpu.vector_store %arg6[%c0_139, %c0_140, %c0_141], %140 {strides = array<i32>} : memref<1x8x64xf32, #tpu.memory_space<vmem>>, vector<1x8x64xf32>,
    return
  }
  func.func @transform_0(%arg0: i32) -> (i32, i32, i32, i32, i32) {
    %c0_i32 = arith.constant 0 : i32
    %c0_i32_0 = arith.constant 0 : i32
    %c0_i32_1 = arith.constant 0 : i32
    %c0_i32_2 = arith.constant 0 : i32
    %c0_i32_3 = arith.constant 0 : i32
    return %arg0, %c0_i32, %c0_i32_0, %c0_i32_1, %c0_i32_2 : i32, i32, i32, i32, i32
  }
  func.func @transform_1(%arg0: i32) -> (i32, i32, i32) {
    %c0_i32 = arith.constant 0 : i32
    %c0_i32_0 = arith.constant 0 : i32
    %c0_i32_1 = arith.constant 0 : i32
    %c0_i32_2 = arith.constant 0 : i32
    return %c0_i32, %c0_i32_0, %c0_i32_1 : i32, i32, i32
  }
  func.func @transform_2(%arg0: i32) -> (i32, i32) {
    %c0_i32 = arith.constant 0 : i32
    %c0_i32_0 = arith.constant 0 : i32
    %c0_i32_1 = arith.constant 0 : i32
    return %c0_i32, %c0_i32_0 : i32, i32
  }
  func.func @transform_3(%arg0: i32) -> (i32, i32, i32) {
    %c0_i32 = arith.constant 0 : i32
    %c0_i32_0 = arith.constant 0 : i32
    %c0_i32_1 = arith.constant 0 : i32
    %c0_i32_2 = arith.constant 0 : i32
    return %c0_i32, %c0_i32_0, %c0_i32_1 : i32, i32, i32
  }
  func.func @transform_4(%arg0: i32) -> (i32, i32) {
    %c0_i32 = arith.constant 0 : i32
    %c0_i32_0 = arith.constant 0 : i32
    %c0_i32_1 = arith.constant 0 : i32
    return %c0_i32, %c0_i32_0 : i32, i32
  }
  func.func @transform_5(%arg0: i32) -> (i32, i32, i32) {
    %c0_i32 = arith.constant 0 : i32
    %c0_i32_0 = arith.constant 0 : i32
    %c0_i32_1 = arith.constant 0 : i32
    return %arg0, %c0_i32, %c0_i32_0 : i32, i32, i32
  }
}

</mosaic_0001>

<bundles_post_ra>
// kernel: down_forward.1
= control target key start
LH: loop header
LB: loop body
LE: loop exit
PB: predicated region body
PF: predicated region fallthrough
CT: control target
= control target key end

     0   :  { %s4529_s18 = smov 0   ;;  %s5354_s0 = inlined_call_operand.vmem [shape: f32[2,8,2,8,8], index: 0, kind: input, shape index: {}]   ;;  %s5355_s1 = inlined_call_operand.vmem [shape: bf16[9,4,8], index: 1, kind: input, shape index: {}]   ;;  %s5356_s2 = inlined_call_operand.vmem [shape: f32[1,8], index: 2, kind: input, shape index: {}]   ;;  %s5357_s3 = inlined_call_operand.vmem [shape: bf16[9,8,8], index: 3, kind: input, shape index: {}]   ;;  %s5358_s4 = inlined_call_operand.vmem [shape: f32[1,8], index: 4, kind: input, shape index: {}]   ;;  %s5359_s5 = inlined_call_operand.vmem [shape: f32[2,8,64], index: 5, kind: output, shape index: {}]  }
   0x1 LB: > { %s3770_s19 = sadd.s32 4294967295, %s4495_s18   ;;  %p3774_p0 = scmp.ge.s32.totalorder %s4495_s18, 1  ;;  %s4495_s18 = sphi %s4529_s18, %s15_s18  }
   0x2   : > { %p187_p1 = scmp.lt.s32.totalorder %s4495_s18, 3 }
   0x4   : > { %p188_p2 = pnand %p3774_p0, %p187_p1 }
   0x5   : > { %p4537_p3 = scmp.lt.s32.totalorder (!%p188_p2), %s3770_s19, 1  ;;  %vm224_vm0 = vcmask (!%p188_p2), 60416   ;;  %vm226_vm1 = vcmask (!%p188_p2), 57344   ;;  %v4497_v0 = vmov (!%p188_p2), 0   ;;  %s4498_s25 = smov (!%p188_p2), 124   ;;  %vm636_vm2 = vcmask (!%p188_p2), 1041408  }
   0x6   : > { %191 = sbr.rel (%p188_p2) target bundleno = 1036 (0x40c), region = 40  ;;  %234 = vst.msk [vmem:[#allocation2 + $0x20] sm:$0xf] (!%p188_p2), %vm224_vm0, %v4497_v0  ;;  %236 = vst.msk [vmem:[#allocation2 + $0x28] sm:$0xf] (!%p188_p2), %vm224_vm0, %v4497_v0  ;;  %vm423_vm3 = vcmask (!%p188_p2), 27648  }
   0x7   : > { %235 = vst.msk [vmem:[#allocation2 + $0x24] sm:$0x1] (!%p188_p2), %vm226_vm1, %v4497_v0  ;;  %237 = vst.msk [vmem:[#allocation2 + $0x2c] sm:$0x1] (!%p188_p2), %vm226_vm1, %v4497_v0  ;;  %v3786_v28 = vld [vmem:[%s5355_s1 + $0x2] sm:$0x3] (!%p188_p2) }
   0x8   : > { %225 = vst.msk [vmem:[#allocation2] sm:$0xf] (!%p188_p2), %vm224_vm0, %v4497_v0  ;;  %228 = vst.msk [vmem:[#allocation2 + $0x8] sm:$0xf] (!%p188_p2), %vm224_vm0, %v4497_v0  ;;  %4421 = vmatprep.subr.msk.bf16.mxu0 (!%p188_p2), %vm636_vm2, %v3786_v28  ;;  %v638_v29 = vsel (!%p188_p2), %vm636_vm2, %v3786_v28, 0  ;;  %vm429_vm5 = vcmask (!%p188_p2), 24576  }
   0x9   : > { %227 = vst.msk [vmem:[#allocation2 + $0x4] sm:$0x1] (!%p188_p2), %vm226_vm1, %v4497_v0  ;;  %229 = vst.msk [vmem:[#allocation2 + $0xc] sm:$0x1] (!%p188_p2), %vm226_vm1, %v4497_v0  ;;  %4114 = vmatpush3.bf16.msra.mxu0 (!%p188_p2), %v638_v29  ;;  %v4580_v30 = vld [vmem:[%s5355_s1] sm:$0x3] (!%p188_p2) }
   0xa   : > { %230 = vst.msk [vmem:[#allocation2 + $0x10] sm:$0xf] (!%p188_p2), %vm224_vm0, %v4497_v0  ;;  %232 = vst.msk [vmem:[#allocation2 + $0x18] sm:$0xf] (!%p188_p2), %vm224_vm0, %v4497_v0  ;;  %4422 = vmatprep.subr.msk.bf16.mxu0 (!%p188_p2), %vm636_vm2, %v4580_v30  ;;  %vm424_vm4 = vsmask.f32 (!%p188_p2), 7938 }
   0xb   : > { %231 = vst.msk [vmem:[#allocation2 + $0x14] sm:$0x1] (!%p188_p2), %vm226_vm1, %v4497_v0  ;;  %233 = vst.msk [vmem:[#allocation2 + $0x1c] sm:$0x1] (!%p188_p2), %vm226_vm1, %v4497_v0  ;;  %vm430_vm6 = vsmask.f32 (!%p188_p2), 256 }
   0xc   : > { %238 = vst.msk [vmem:[#allocation2 + $0x30] sm:$0xf] (!%p188_p2), %vm224_vm0, %v4497_v0  ;;  %240 = vst.msk [vmem:[#allocation2 + $0x38] sm:$0xf] (!%p188_p2), %vm224_vm0, %v4497_v0  ;;  %vm494_vm9 = vsmask.f32 (!%p188_p2), 3328 }
   0xd   : > { %239 = vst.msk [vmem:[#allocation2 + $0x34] sm:$0x1] %vm226_vm1, %v4497_v0  ;;  %241 = vst.msk [vmem:[#allocation2 + $0x3c] sm:$0x1] %vm226_vm1, %v4497_v0  ;;  %s5374_s19 = smov (!%p4537_p3, %s3770_s19), 1  ;;  %vm623_vm12 = vcmask 31744  }
   0xe   : > { %242 = vst.msk [vmem:[#allocation2 + $0x40] sm:$0xf] %vm224_vm0, %v4497_v0  ;;  %244 = vst.msk [vmem:[#allocation2 + $0x48] sm:$0xf] %vm224_vm0, %v4497_v0  ;;  %s4006_s21 = sshll.u32 %s5374_s19, 7  ;;  %vm829_vm13 = vcmask 1042432  }
   0xf   : > { %243 = vst.msk [vmem:[#allocation2 + $0x44] sm:$0x1] %vm226_vm1, %v4497_v0  ;;  %245 = vst.msk [vmem:[#allocation2 + $0x4c] sm:$0x1] %vm226_vm1, %v4497_v0  ;;  %s218_s24 = scalar_lea.vmem %s5354_s0, %s4006_s21  ;;  %v4584_v35 = vld [vmem:[#allocation2] sm:$0xf] }
  0x10   : > { %v252_v1 = vld [vmem:[%s218_s24 + $0x30] sm:$0xff]  ;;  %v253_v2 = vld [vmem:[%s218_s24 + $0x38] sm:$0xff]  ;;  %v254_v3 = vld [vmem:[%s218_s24 + $0x40] sm:$0xff]  ;;  %v498_v43 = vshrl.u32 %v4584_v35, 16  ;;  %v501_v52 = vshll.u32 %v4584_v35, 16  ;;  %vm830_vm14 = vcmask 1046532  }
  0x11   : > { %v255_v4 = vld [vmem:[%s218_s24 + $0x48] sm:$0xff]  ;;  %v265_v5 = vmax.f32 %v252_v1, %v253_v2  ;;  %v246_v6 = vld [vmem:[%s218_s24] sm:$0xff]  ;;  %v248_v9 = vld [vmem:[%s218_s24 + $0x10] sm:$0xff]  ;;  %vm495_vm10 = vsmask.f32 7440  ;;  %s3777_s20 = sshll.u32 %s5374_s19, 3 }
  0x12   : > { %v247_v7 = vld [vmem:[%s218_s24 + $0x8] sm:$0xff]  ;;  %v266_v8 = vmax.f32 %v254_v3, %v255_v4  ;;  %v249_v10 = vld [vmem:[%s218_s24 + $0x18] sm:$0xff]  ;;  %v256_v12 = vld [vmem:[%s218_s24 + $0x50] sm:$0xff]  ;;  %s222_s23 = scalar_lea.vmem %s5359_s5, %s3777_s20 }
  0x13   : > { %v262_v11 = vmax.f32 %v246_v6, %v247_v7  ;;  %v263_v13 = vmax.f32 %v248_v9, %v249_v10  ;;  %v257_v14 = vld [vmem:[%s218_s24 + $0x58] sm:$0xff]  ;;  %v258_v15 = vld [vmem:[%s218_s24 + $0x60] sm:$0xff]  ;;  %v259_v16 = vld [vmem:[%s218_s24 + $0x68] sm:$0xff] }
  0x14   : > { %v4455_v17 = vpack.i.bf16 %v266_v8, %v265_v5  ;;  %v4569_v18 = vmax.f32 %v256_v12, %v257_v14  ;;  %v268_v19 = vmax.f32 %v258_v15, %v259_v16  ;;  %v250_v20 = vld [vmem:[%s218_s24 + $0x20] sm:$0xff]  ;;  %v251_v21 = vld [vmem:[%s218_s24 + $0x28] sm:$0xff]  ;;  %v260_v25 = vld [vmem:[%s218_s24 + $0x70] sm:$0xff] }
  0x15   : > { %v4450_v22 = vpack.i.bf16 %v263_v13, %v262_v11  ;;  %v264_v24 = vmax.f32 %v250_v20, %v251_v21  ;;  %v261_v26 = vld [vmem:[%s218_s24 + $0x78] sm:$0xff]  ;;  %v447_v57 = vld [vmem:[#allocation2 + $0x20] sm:$0xf]  ;;  %v450_v58 = vld [vmem:[#allocation2 + $0x24] sm:$0x1] }
  0x16   : > { %4456 = vrot.lane.b32.xlu1 %v4455_v17, %s4498_s25  ;;  %v4460_v23 = vpack.i.bf16 %v268_v19, %v4569_v18  ;;  %v269_v27 = vmax.f32 %v260_v25, %v261_v26  ;;  %v453_v63 = vld [vmem:[#allocation2 + $0x28] sm:$0xf]  ;;  %v456_v0 = vld [vmem:[#allocation2 + $0x2c] sm:$0x1]  ;;  %vm4591_vm7 = vmand %vm423_vm3, %vm424_vm4 }
  0x17   : > { %4451 = vrot.lane.b32.xlu0 %v4450_v22, %s4498_s25  ;;  %v426_v7 = vld [vmem:[#allocation2 + $0x8] sm:$0xf]  ;;  %vm4597_vm8 = vmand %vm429_vm5, %vm430_vm6 }
  0x18   : > { %vm4657_vm11 = vmor %vm494_vm9, %vm495_vm10 }
  0x19   : > { %vm4734_vm15 = vmor %vm829_vm13, %vm830_vm14 }
  0x1a   : > { %4461 = vrot.lane.b32.xlu1 %v4460_v23, %s4498_s25  ;;  %vm4984_vm3 = vmand %vm224_vm0, %vm424_vm4  ;;  %vm2308_vm0 = vcmask 64512  }
  0x1b   : > { %282 = vrot.lane.b32.xlu0 %v264_v24, %s4498_s25  ;;  %vm4991_vm5 = vmand %vm226_vm1, %vm430_vm6  ;;  %vm3715_vm1 = vcmask 523264  }
  0x1f   : > { %292 = vrot.lane.b32.xlu0 %v269_v27, %s4498_s25 }
  0x88   : > { %v4457_v31 = vpop.permute.xlu1 %4456 }
  0x89   : > { %v4459_v32 = vunpack.i.h.bf16 %v4457_v31  ;;  %v4458_v33 = vunpack.i.l.bf16 %v4457_v31  ;;  %v4452_v34 = vpop.permute.xlu0 %4451 }
  0x8a   : > { %v4454_v36 = vunpack.i.h.bf16 %v4452_v34  ;;  %v4453_v37 = vunpack.i.l.bf16 %v4452_v34 }
  0x8b   : > { %v306_v38 = vmax.f32 %v266_v8, %v4459_v32  ;;  %v305_v39 = vmax.f32 %v265_v5, %v4458_v33  ;;  %v432_v8 = vld [vmem:[#allocation2 + $0xc] sm:$0x1] }
  0x8c   : > { %v303_v40 = vmax.f32 %v263_v13, %v4454_v36  ;;  %v302_v41 = vmax.f32 %v262_v11, %v4453_v37  ;;  %v4462_v42 = vpop.permute.xlu1 %4461 }
  0x8d   : > { %v4011_v44 = vpack.c.bf16 %v306_v38, %v306_v38  ;;  %v4010_v45 = vpack.c.bf16 %v305_v39, %v305_v39  ;;  %v4464_v46 = vunpack.i.h.bf16 %v4462_v42  ;;  %v4463_v47 = vunpack.i.l.bf16 %v4462_v42  ;;  %v283_v48 = vpop.permute.xlu0 %282 }
  0x8e   : > { %v4008_v49 = vpack.c.bf16 %v303_v40, %v303_v40  ;;  %v4007_v50 = vpack.c.bf16 %v302_v41, %v302_v41  ;;  %v304_v51 = vmax.f32 %v264_v24, %v283_v48  ;;  %v500_v38 = vrot.slane %v498_v43, 4  ;;  %v462_v48 = vld [vmem:[#allocation2 + $0x34] sm:$0x1] }
  0x8f   : > { %v375_v53 = vshrl.u32 %v4011_v44, 16  ;;  %v378_v54 = vshll.u32 %v4011_v44, 16  ;;  %v367_v55 = vshrl.u32 %v4010_v45, 16  ;;  %v370_v56 = vshll.u32 %v4010_v45, 16  ;;  %v441_v45 = vld [vmem:[#allocation2 + $0x18] sm:$0xf] }
  0x90   : > { %v351_v59 = vshrl.u32 %v4008_v49, 16  ;;  %v354_v60 = vshll.u32 %v4008_v49, 16  ;;  %v343_v61 = vshrl.u32 %v4007_v50, 16  ;;  %v346_v62 = vshll.u32 %v4007_v50, 16 }
  0x91   : > { %v377_v1 = vrot.slane %v375_v53, 7  ;;  %v369_v2 = vrot.slane %v367_v55, 7  ;;  %v308_v3 = vmax.f32 %v268_v19, %v4464_v46  ;;  %v307_v4 = vmax.f32 %v4569_v18, %v4463_v47  ;;  %v293_v5 = vpop.permute.xlu0 %292  ;;  %v435_v18 = vld [vmem:[#allocation2 + $0x10] sm:$0xf]  ;;  %v438_v19 = vld [vmem:[#allocation2 + $0x14] sm:$0x1] }
  0x92   : > { %v353_v9 = vrot.slane %v351_v59, 7  ;;  %v345_v10 = vrot.slane %v343_v61, 7  ;;  %v4009_v11 = vpack.c.bf16 %v304_v51, %v304_v51  ;;  %v309_v12 = vmax.f32 %v269_v27, %v293_v5  ;;  %v444_v46 = vld [vmem:[#allocation2 + $0x1c] sm:$0x1]  ;;  %v459_v47 = vld [vmem:[#allocation2 + $0x30] sm:$0xf] }
  0x93   : > { %v380_v14 = vor.u32 %v378_v54, %v377_v1  ;;  %v381_v15 = vrot.slane %v377_v1, 4  ;;  %v372_v16 = vor.u32 %v370_v56, %v369_v2  ;;  %v373_v17 = vrot.slane %v369_v2, 4  ;;  %v4619_v54 = vld [vmem:[#allocation2 + $0x4] sm:$0x1]  ;;  %v471_v2 = vld [vmem:[#allocation2 + $0x40] sm:$0xf] }
  0x94   : > { %v356_v20 = vor.u32 %v354_v60, %v353_v9  ;;  %v357_v21 = vrot.slane %v353_v9, 4  ;;  %v348_v22 = vor.u32 %v346_v62, %v345_v10  ;;  %v349_v23 = vrot.slane %v345_v10, 4 }
  0x95   : > { %v454_v24 = vsel %vm4591_vm7, %v380_v14, %v453_v63  ;;  %v457_v25 = vsel %vm4597_vm8, %v381_v15, %v456_v0  ;;  %v448_v26 = vsel %vm4591_vm7, %v372_v16, %v447_v57  ;;  %v451_v27 = vsel %vm4597_vm8, %v373_v17, %v450_v58  ;;  %v468_v57 = vld [vmem:[#allocation2 + $0x3c] sm:$0x1] }
  0x96   : > { %455 = vst [vmem:[#allocation2 + $0x28] sm:$0xf] %v454_v24  ;;  %458 = vst [vmem:[#allocation2 + $0x2c] sm:$0x1] %v457_v25  ;;  %v436_v28 = vsel %vm4591_vm7, %v356_v20, %v435_v18  ;;  %v439_v29 = vsel %vm4597_vm8, %v357_v21, %v438_v19  ;;  %v427_v31 = vsel %vm4591_vm7, %v348_v22, %v426_v7  ;;  %v359_v36 = vshrl.u32 %v4009_v11, 16 }
  0x97   : > { %449 = vst [vmem:[#allocation2 + $0x20] sm:$0xf] %v448_v26  ;;  %452 = vst [vmem:[#allocation2 + $0x24] sm:$0x1] %v451_v27  ;;  %v433_v32 = vsel %vm4597_vm8, %v349_v23, %v432_v8  ;;  %v4013_v33 = vpack.c.bf16 %v308_v3, %v308_v3  ;;  %v4012_v34 = vpack.c.bf16 %v307_v4, %v307_v4  ;;  %v503_v39 = vrot.slane %v501_v52, 5 }
  0x98   : > { %437 = vst [vmem:[#allocation2 + $0x10] sm:$0xf] %v436_v28  ;;  %440 = vst [vmem:[#allocation2 + $0x14] sm:$0x1] %v439_v29  ;;  %v4014_v37 = vpack.c.bf16 %v309_v12, %v309_v12  ;;  %v361_v49 = vrot.slane %v359_v36, 7  ;;  %v362_v50 = vshll.u32 %v4009_v11, 16 }
  0x99   : > { %428 = vst [vmem:[#allocation2 + $0x8] sm:$0xf] %v427_v31  ;;  %434 = vst [vmem:[#allocation2 + $0xc] sm:$0x1] %v433_v32  ;;  %v391_v40 = vshrl.u32 %v4013_v33, 16  ;;  %v394_v41 = vshll.u32 %v4013_v33, 16  ;;  %v504_v61 = vor.u32 %v503_v39, %v500_v38 }
  0x9a   : > { %v383_v42 = vshrl.u32 %v4012_v34, 16  ;;  %v386_v44 = vshll.u32 %v4012_v34, 16  ;;  %v399_v51 = vshrl.u32 %v4014_v37, 16  ;;  %v402_v53 = vshll.u32 %v4014_v37, 16  ;;  %v465_v52 = vld [vmem:[#allocation2 + $0x38] sm:$0xf] }
  0x9b   : > { %v393_v55 = vrot.slane %v391_v40, 7  ;;  %v507_v43 = vshll.u32 %v4619_v54, 16  ;;  %v364_v58 = vor.u32 %v362_v50, %v361_v49  ;;  %v365_v59 = vrot.slane %v361_v49, 4  ;;  %v474_v3 = vld [vmem:[#allocation2 + $0x44] sm:$0x1] }
  0x9c   : > { %v385_v56 = vrot.slane %v383_v42, 7  ;;  %v401_v60 = vrot.slane %v399_v51, 7  ;;  %v505_v25 = vrot.slane %v504_v61, 4 }
  0x9d   : > { %v396_v62 = vor.u32 %v394_v41, %v393_v55  ;;  %v397_v63 = vrot.slane %v393_v55, 4  ;;  %v442_v4 = vsel %vm4591_vm7, %v364_v58, %v441_v45  ;;  %v445_v5 = vsel %vm4597_vm8, %v365_v59, %v444_v46  ;;  %v4653_v28 = vld [vmem:[#allocation2 + $0x28] sm:$0xf] }
  0x9e   : > { %v388_v0 = vor.u32 %v386_v44, %v385_v56  ;;  %v389_v1 = vrot.slane %v385_v56, 4  ;;  %v404_v7 = vor.u32 %v402_v53, %v401_v60  ;;  %v405_v8 = vrot.slane %v401_v60, 4  ;;  %443 = vst [vmem:[#allocation2 + $0x18] sm:$0xf] %v442_v4  ;;  %446 = vst [vmem:[#allocation2 + $0x1c] sm:$0x1] %v445_v5 }
  0x9f   : > { %v466_v11 = vsel %vm4591_vm7, %v396_v62, %v465_v52  ;;  %v469_v12 = vsel %vm4597_vm8, %v397_v63, %v468_v57  ;;  %v4638_v16 = vld [vmem:[#allocation2 + $0x10] sm:$0xf]  ;;  %v4646_v21 = vld [vmem:[#allocation2 + $0x14] sm:$0x1]  ;;  %v4648_v22 = vld [vmem:[#allocation2 + $0x20] sm:$0xf] }
  0xa0   : > { %v4626_v9 = vld [vmem:[#allocation2 + $0x8] sm:$0xf]  ;;  %v4628_v10 = vld [vmem:[#allocation2 + $0xc] sm:$0x1]  ;;  %v460_v14 = vsel %vm4591_vm7, %v388_v0, %v459_v47  ;;  %v463_v15 = vsel %vm4597_vm8, %v389_v1, %v462_v48  ;;  %467 = vst [vmem:[#allocation2 + $0x38] sm:$0xf] %v466_v11  ;;  %v472_v17 = vsel %vm4591_vm7, %v404_v7, %v471_v2  ;;  %v475_v18 = vsel %vm4597_vm8, %v405_v8, %v474_v3 }
  0xa1   : > { %470 = vst [vmem:[#allocation2 + $0x3c] sm:$0x1] %v469_v12  ;;  %461 = vst [vmem:[#allocation2 + $0x30] sm:$0xf] %v460_v14  ;;  %v512_v19 = vshrl.u32 %v4626_v9, 16  ;;  %v515_v20 = vshll.u32 %v4626_v9, 16 }
  0xa2   : > { %464 = vst [vmem:[#allocation2 + $0x34] sm:$0x1] %v463_v15  ;;  %473 = vst [vmem:[#allocation2 + $0x40] sm:$0xf] %v472_v17  ;;  %v521_v23 = vshll.u32 %v4628_v10, 16  ;;  %v526_v24 = vshrl.u32 %v4638_v16, 16 }
  0xa3   : > { %476 = vst [vmem:[#allocation2 + $0x44] sm:$0x1] %v475_v18  ;;  %v529_v6 = vshll.u32 %v4638_v16, 16  ;;  %v509_v26 = vrot.slane %v507_v43, 5  ;;  %v514_v13 = vrot.slane %v512_v19, 4  ;;  %v517_v27 = vrot.slane %v515_v20, 5 }
  0xa4   : > { %v528_v31 = vrot.slane %v526_v24, 4  ;;  %v535_v33 = vshll.u32 %v4646_v21, 16  ;;  %v4662_v34 = vld [vmem:[#allocation2 + $0x24] sm:$0x1]  ;;  %v554_v36 = vshrl.u32 %v4648_v22, 16  ;;  %v523_v38 = vrot.slane %v521_v23, 5 }
  0xa5   : > { %v531_v32 = vrot.slane %v529_v6, 5  ;;  %v518_v37 = vor.u32 %v517_v27, %v514_v13  ;;  %v557_v39 = vshll.u32 %v4648_v22, 16  ;;  %v563_v40 = vshll.u32 %v4662_v34, 16  ;;  %v4671_v48 = vld [vmem:[#allocation2 + $0x18] sm:$0xf] }
  0xa6   : > { %v556_v42 = vrot.slane %v554_v36, 4  ;;  %v568_v44 = vshrl.u32 %v4653_v28, 16  ;;  %v571_v45 = vshll.u32 %v4653_v28, 16  ;;  %v510_v46 = vsel %vm4657_vm11, %v505_v25, %v509_v26  ;;  %v4673_v49 = vld [vmem:[#allocation2 + $0x1c] sm:$0x1] }
  0xa7   : > { %v532_v41 = vor.u32 %v531_v32, %v528_v31  ;;  %v519_v47 = vrot.slane %v518_v37, 4  ;;  %v559_v50 = vrot.slane %v557_v39, 5  ;;  %v540_v51 = vshrl.u32 %v4671_v48, 16  ;;  %v4682_v62 = vld [vmem:[#allocation2 + $0x38] sm:$0xf] }
  0xa8   : > { %v543_v53 = vshll.u32 %v4671_v48, 16  ;;  %v537_v56 = vrot.slane %v535_v33, 5  ;;  %v549_v43 = vshll.u32 %v4673_v49, 16  ;;  %v4680_v57 = vld [vmem:[#allocation2 + $0x30] sm:$0xf]  ;;  %v565_v1 = vrot.slane %v563_v40, 5 }
  0xa9   : > { %v524_v55 = vsel %vm4657_vm11, %v519_v47, %v523_v38  ;;  %v560_v52 = vor.u32 %v559_v50, %v556_v42  ;;  %v533_v59 = vrot.slane %v532_v41, 4  ;;  %v542_v60 = vrot.slane %v540_v51, 4  ;;  %v4684_v63 = vld [vmem:[#allocation2 + $0x2c] sm:$0x1]  ;;  %v4688_v7 = vld [vmem:[#allocation2 + $0x34] sm:$0x1] }
  0xaa   : > { %v3787_v58 = vcombine.low %v510_v46, %v524_v55  ;;  %v545_v61 = vrot.slane %v543_v53, 5  ;;  %v570_v2 = vrot.slane %v568_v44, 4  ;;  %v573_v3 = vrot.slane %v571_v45, 5  ;;  %v4696_v25 = vld [vmem:[#allocation2 + $0x3c] sm:$0x1] }
  0xab   : > { %v561_v0 = vrot.slane %v560_v52, 4  ;;  %v577_v5 = vshll.u32 %v4684_v63, 16  ;;  %v582_v8 = vshrl.u32 %v4680_v57, 16  ;;  %v585_v11 = vshll.u32 %v4680_v57, 16  ;;  %v3811_v44 = vld [vmem:[%s5355_s1 + $0x4] sm:$0x3] }
  0xac   : > { %4115 = vmatprep.mubr.msk.bf16.mxu0 %vm623_vm12, %v3787_v58  ;;  %v546_v4 = vor.u32 %v545_v61, %v542_v60  ;;  %v551_v12 = vrot.slane %v549_v43, 5  ;;  %v574_v14 = vor.u32 %v573_v3, %v570_v2  ;;  %v591_v15 = vshll.u32 %v4688_v7, 16  ;;  %v805_v55 = vld [vmem:[#allocation2] sm:$0xe] }
  0xad   : > { %v596_v17 = vshrl.u32 %v4682_v62, 16  ;;  %v579_v19 = vrot.slane %v577_v5, 5  ;;  %v584_v20 = vrot.slane %v582_v8, 4  ;;  %v587_v23 = vrot.slane %v585_v11, 5 }
  0xae   : > { %v547_v18 = vrot.slane %v546_v4, 4  ;;  %v566_v24 = vsel %vm4657_vm11, %v561_v0, %v565_v1  ;;  %v575_v6 = vrot.slane %v574_v14, 4  ;;  %v599_v13 = vshll.u32 %v4682_v62, 16  ;;  %v807_v1 = vld [vmem:[#allocation2 + $0x10] sm:$0xe] }
  0xaf   : > { %v598_v26 = vrot.slane %v596_v17, 4  ;;  %v538_v27 = vsel %vm4657_vm11, %v533_v59, %v537_v56  ;;  %v588_v32 = vor.u32 %v587_v23, %v584_v20  ;;  %v605_v33 = vshll.u32 %v4696_v25, 16  ;;  %v806_v56 = vld [vmem:[#allocation2 + $0x8] sm:$0xe] }
  0xb0   : > { %v552_v31 = vsel %vm4657_vm11, %v547_v18, %v551_v12  ;;  %v738_v37 = vsel %vm636_vm2, %v4580_v30, 0  ;;  %v580_v38 = vsel %vm4657_vm11, %v575_v6, %v579_v19  ;;  %v601_v39 = vrot.slane %v599_v13, 5  ;;  %v812_v18 = vld [vmem:[#allocation2 + $0x38] sm:$0xe]  ;;  %v3829_v20 = vld [vmem:[%s5355_s1 + $0x8] sm:$0x3] }
  0xb1   : > { %v3788_v36 = vcombine.low %v538_v27, %v552_v31  ;;  %v3789_v40 = vcombine.low %v566_v24, %v580_v38  ;;  %v589_v41 = vrot.slane %v588_v32, 4  ;;  %v593_v42 = vrot.slane %v591_v15, 5  ;;  %v4763_v23 = vld [vmem:[#allocation2 + $0x8] sm:$0xf]  ;;  %v1086_v27 = vld [vmem:[#allocation2 + $0x10] sm:$0xf] }
  0xb2   : > { %v602_v45 = vor.u32 %v601_v39, %v598_v26  ;;  %v607_v46 = vrot.slane %v605_v33, 5  ;;  %v3795_v53 = vcombine.low %v4584_v35, %v4626_v9  ;;  %v3796_v43 = vcombine.low %v4638_v16, %v4671_v48  ;;  %v3820_v35 = vld [vmem:[%s5355_s1 + $0x6] sm:$0x3]  ;;  %v810_v48 = vld [vmem:[#allocation2 + $0x28] sm:$0xe] }
  0xb3   : > { %4116 = vmatmul.mubr.msk.bf16.vlgmr.msra.gmra.mrb[0].mxu0 %vm623_vm12, %v3788_v36  ;;  %v594_v30 = vsel %vm4657_vm11, %v589_v41, %v593_v42  ;;  %v891_v52 = vsel %vm636_vm2, %v3811_v44, 0  ;;  %v3797_v58 = vcombine.low %v4648_v22, %v4653_v28  ;;  %v834_v9 = vrot.slane %v4619_v54, 5  ;;  %v809_v28 = vld [vmem:[#allocation2 + $0x20] sm:$0xe]  ;;  %v1088_v42 = vld [vmem:[#allocation2 + $0x18] sm:$0xf] }
  0xb4   : > { %4124 = vmatpush3.bf16.msra.mxu0 %v738_v37  ;;  %4119 = vmatprep.mubr.msk.bf16.mxu0 %vm623_vm12, %v3789_v40  ;;  %v603_v47 = vrot.slane %v602_v45, 4  ;;  %v838_v59 = vrot.slane %v4628_v10, 5  ;;  %v3803_v60 = vrot.slane %v805_v55, 9  ;;  %v3804_v61 = vrot.slane %v806_v56, 9  ;;  %v808_v10 = vld [vmem:[#allocation2 + $0x18] sm:$0xe] }
  0xb5   : > { %4423 = vmatprep.subr.msk.bf16.mxu0 %vm636_vm2, %v3811_v44  ;;  %v3798_v0 = vcombine.low %v4680_v57, %v4682_v62  ;;  %v846_v2 = vrot.slane %v4673_v49, 5  ;;  %v3806_v4 = vrot.slane %v808_v10, 9  ;;  %v3807_v5 = vrot.slane %v809_v28, 9  ;;  %v811_v62 = vld [vmem:[#allocation2 + $0x30] sm:$0xe] }
  0xb6   : > { %v608_v50 = vsel %vm4657_vm11, %v603_v47, %v607_v46  ;;  %v835_v22 = vsel %vm4734_vm15, %v3803_v60, %v834_v9  ;;  %v839_v54 = vsel %vm4734_vm15, %v3804_v61, %v838_v59  ;;  %v850_v8 = vrot.slane %v4662_v34, 5  ;;  %v1090_v44 = vld [vmem:[#allocation2 + $0x20] sm:$0xf]  ;;  %v4469_v45 = vld [vmem:[#allocation2 + $0x8] ss:$8 sps:$4 sm:$0xff]  }
  0xb7   : > { %v3790_v51 = vcombine.low %v594_v30, %v608_v50  ;;  %v3812_v3 = vcombine.low %v835_v22, %v839_v54  ;;  %v3808_v11 = vrot.slane %v810_v48, 9  ;;  %v854_v12 = vrot.slane %v4684_v63, 5  ;;  %v4777_v46 = vld [vmem:[#allocation2 + $0xc] sm:$0x1]  ;;  %v4779_v47 = vld [vmem:[#allocation2 + $0x14] sm:$0x1] }
  0xb8   : > { %v842_v14 = vrot.slane %v4646_v21, 5  ;;  %v3805_v15 = vrot.slane %v807_v1, 9  ;;  %v847_v57 = vsel %vm4734_vm15, %v3806_v4, %v846_v2  ;;  %v851_v49 = vsel %vm4734_vm15, %v3807_v5, %v850_v8  ;;  %v1094_v55 = vld [vmem:[#allocation2 + $0x30] sm:$0xf]  ;;  %v4470_v61 = vld [vmem:[#allocation2 + $0x18] ss:$8 sps:$4 sm:$0xff]  }
  0xb9   : > { %v855_v17 = vsel %vm4734_vm15, %v3808_v11, %v854_v12  ;;  %v1009_v21 = vsel %vm636_vm2, %v3820_v35, 0  ;;  %v3809_v19 = vrot.slane %v811_v62, 9  ;;  %v858_v6 = vrot.slane %v4688_v7, 5  ;;  %v4788_v54 = vld [vmem:[%s5355_s1 + $0xa] sm:$0x3] }
  0xba   : > { %v843_v34 = vsel %vm4734_vm15, %v3805_v15, %v842_v14  ;;  %v3814_v24 = vcombine.low %v851_v49, %v855_v17  ;;  %v3810_v26 = vrot.slane %v812_v18, 9  ;;  %v862_v13 = vrot.slane %v4696_v25, 5  ;;  %v4790_v8 = vld [vmem:[#allocation2 + $0x24] sm:$0x1]  ;;  %v1096_v11 = vld [vmem:[#allocation2 + $0x38] sm:$0xf] }
  0xbb   : > { %4120 = vmatmul.mubr.msk.bf16.gmra.mrb[4].mxu0 %vm623_vm12, %v3790_v51  ;;  %v3813_v63 = vcombine.low %v843_v34, %v847_v57  ;;  %v1101_v31 = vshrl.u32 %v4763_v23, 16  ;;  %v1104_v32 = vshll.u32 %v4763_v23, 16  ;;  %v1115_v33 = vshrl.u32 %v1086_v27, 16  ;;  %v1098_v57 = vld [vmem:[#allocation2 + $0x40] sm:$0xf] }
  0xbc   : > { %4125 = vmatprep.mubr.msk.bf16.mxu0 %vm623_vm12, %v3795_v53  ;;  %v1118_v36 = vshll.u32 %v1086_v27, 16  ;;  %v859_v7 = vsel %vm4734_vm15, %v3809_v19, %v858_v6  ;;  %v863_v25 = vsel %vm4734_vm15, %v3810_v26, %v862_v13  ;;  %v1129_v50 = vshrl.u32 %v1088_v42, 16  ;;  %v4796_v49 = vld [vmem:[#allocation2 + $0x1c] sm:$0x1] }
  0xbd   : > { %v1103_v37 = vrot.slane %v1101_v31, 4  ;;  %v1106_v38 = vrot.slane %v1104_v32, 5  ;;  %v3815_v39 = vcombine.low %v859_v7, %v863_v25  ;;  %v1117_v40 = vrot.slane %v1115_v33, 4  ;;  %v4806_v31 = vld [vmem:[#allocation2 + $0x2c] sm:$0x1] }
  0xbe   : > { %v1120_v41 = vrot.slane %v1118_v36, 5  ;;  %v1132_v51 = vshll.u32 %v1088_v42, 16  ;;  %v1143_v53 = vshrl.u32 %v1090_v44, 16  ;;  %v1124_v9 = vshll.u32 %v4779_v47, 16  ;;  %v4472_v25 = vld [vmem:[#allocation2 + $0x38] ss:$8 sps:$4 sm:$0xff]  }
  0xbf   : > { %v1107_v30 = vor.u32 %v1106_v38, %v1103_v37  ;;  %v1171_v59 = vshrl.u32 %v1094_v55, 16  ;;  %v1174_v60 = vshll.u32 %v1094_v55, 16  ;;  %v1131_v10 = vrot.slane %v1129_v50, 4 }
  0xc0   : > { %v1121_v56 = vor.u32 %v1120_v41, %v1117_v40  ;;  %v1134_v28 = vrot.slane %v1132_v51, 5  ;;  %v1145_v48 = vrot.slane %v1143_v53, 4  ;;  %v1126_v12 = vrot.slane %v1124_v9, 5  ;;  %v4812_v53 = vld [vmem:[#allocation2 + $0x3c] sm:$0x1] }
  0xc1   : > { %v1108_v22 = vrot.slane %v1107_v30, 4  ;;  %v1173_v14 = vrot.slane %v1171_v59, 4  ;;  %v1176_v15 = vrot.slane %v1174_v60, 5  ;;  %v1152_v18 = vshll.u32 %v4790_v8, 16 }
  0xc2   : > { %v1122_v1 = vrot.slane %v1121_v56, 4  ;;  %v1135_v17 = vor.u32 %v1134_v28, %v1131_v10  ;;  %v1188_v6 = vshll.u32 %v1096_v11, 16  ;;  %v1199_v26 = vshrl.u32 %v1098_v57, 16  ;;  %v1315_v10 = vld [vmem:[#allocation2 + $0x10] sm:$0xe] }
  0xc3   : > { %4126 = vmatmul.mubr.msk.bf16.vlgmr.msra.gmra.mrb[0].mxu0 %vm623_vm12, %v3796_v43  ;;  %v1146_v43 = vshll.u32 %v1090_v44, 16  ;;  %v1202_v13 = vshll.u32 %v1098_v57, 16  ;;  %v1138_v27 = vshll.u32 %v4796_v49, 16  ;;  %v1177_v32 = vor.u32 %v1176_v15, %v1173_v14 }
  0xc4   : > { %4134 = vmatpush3.bf16.msra.mxu0 %v891_v52  ;;  %4129 = vmatprep.mubr.msk.bf16.mxu0 %vm623_vm12, %v3797_v58  ;;  %v1110_v52 = vshll.u32 %v4777_v46, 16  ;;  %v1092_v58 = vld [vmem:[#allocation2 + $0x28] sm:$0xf]  ;;  %v1127_v34 = vsel %vm4657_vm11, %v1122_v1, %v1126_v12  ;;  %v1154_v36 = vrot.slane %v1152_v18, 5  ;;  %v1166_v7 = vshll.u32 %v4806_v31, 16 }
  0xc5   : > { %4424 = vmatprep.subr.msk.bf16.mxu0 %vm636_vm2, %v3820_v35  ;;  %v1239_v35 = vsel %vm636_vm2, %v3829_v20, 0  ;;  %v1148_v2 = vrot.slane %v1146_v43, 5  ;;  %v1160_v4 = vshll.u32 %v1092_v58, 16  ;;  %v1136_v38 = vrot.slane %v1135_v17, 4  ;;  %v1316_v17 = vld [vmem:[#allocation2 + $0x18] sm:$0xe] }
  0xc6   : > { %v1112_v5 = vrot.slane %v1110_v52, 5  ;;  %v1190_v42 = vrot.slane %v1188_v6, 5  ;;  %v1201_v44 = vrot.slane %v1199_v26, 4  ;;  %v1140_v30 = vrot.slane %v1138_v27, 5  ;;  %v4816_v52 = vld [vmem:[#allocation2 + $0x44] sm:$0x1] }
  0xc7   : > { %v1162_v19 = vrot.slane %v1160_v4, 5  ;;  %v1178_v50 = vrot.slane %v1177_v32, 4  ;;  %v1168_v43 = vrot.slane %v1166_v7, 5  ;;  %v1208_v60 = vshll.u32 %v4816_v52, 16 }
  0xc8   : > { %v1113_v62 = vsel %vm4657_vm11, %v1108_v22, %v1112_v5  ;;  %v1141_v55 = vsel %vm4657_vm11, %v1136_v38, %v1140_v30  ;;  %v1314_v22 = vld [vmem:[#allocation2 + $0x8] sm:$0xe]  ;;  %v1340_v14 = vrot.slane %v4777_v46, 5  ;;  %v3839_v15 = vrot.slane %v1315_v10, 9  ;;  %v1321_v38 = vld [vmem:[#allocation2 + $0x40] sm:$0xe] }
  0xc9   : > { %v3830_v37 = vcombine.low %v1113_v62, %v1127_v34  ;;  %v1210_v5 = vrot.slane %v1208_v60, 5  ;;  %v3838_v12 = vrot.slane %v1314_v22, 9  ;;  %v1317_v34 = vld [vmem:[#allocation2 + $0x20] sm:$0xe]  ;;  %v1348_v6 = vrot.slane %v4796_v49, 5 }
  0xca   : > { %v3841_v26 = vrot.slane %v1317_v34, 9  ;;  %v1356_v32 = vrot.slane %v4806_v31, 5  ;;  %v1320_v49 = vld [vmem:[#allocation2 + $0x38] sm:$0xe]  ;;  %v1595_v60 = vld [vmem:[#allocation2 + $0x20] sm:$0xf] }
  0xcb   : > { %4130 = vmatmul.mubr.msk.bf16.gmra.mrb[4].mxu0 %vm623_vm12, %v3798_v0  ;;  %v4471_v0 = vld [vmem:[#allocation2 + $0x28] ss:$8 sps:$4 sm:$0xff]   ;;  %v1341_v18 = vsel %vm4734_vm15, %v3838_v12, %v1340_v14  ;;  %v1593_v30 = vld [vmem:[#allocation2 + $0x18] sm:$0xf]  ;;  %v4873_v10 = vld [vmem:[#allocation2 + $0x14] sm:$0x1] }
  0xcc   : > { %4135 = vmatprep.mubr.msk.bf16.mxu0 %vm623_vm12, %v3812_v3  ;;  %v1157_v3 = vshrl.u32 %v1092_v58, 16  ;;  %v1194_v58 = vshll.u32 %v4812_v53, 16  ;;  %v1605_v22 = vld [vmem:[#allocation2 + $0x48] sm:$0xf] }
  0xcd   : > { %v4474_v34 = vld [vmem:[#allocation2 + $0x20] ss:$8 sps:$4 sm:$0xff]  }
  0xce   : > { %v1196_v1 = vrot.slane %v1194_v58, 5 }
  0xd3   : > { %4136 = vmatmul.mubr.msk.bf16.vlgmr.msra.gmra.mrb[0].mxu0 %vm623_vm12, %v3813_v63  ;;  %v1149_v63 = vor.u32 %v1148_v2, %v1145_v48  ;;  %v1397_v48 = vsel %vm636_vm2, %v4788_v54, 0 }
  0xd4   : > { %4144 = vmatpush3.bf16.msra.mxu0 %v1009_v21  ;;  %4139 = vmatprep.mubr.msk.bf16.mxu0 %vm623_vm12, %v3814_v24  ;;  %v1159_v21 = vrot.slane %v1157_v3, 4  ;;  %v1185_v24 = vshrl.u32 %v1096_v11, 16  ;;  %v3855_v11 = vld [vmem:[%s5355_s1 + $0xc] sm:$0x3] }
  0xd5   : > { %4425 = vmatprep.subr.msk.bf16.mxu0 %vm636_vm2, %v3829_v20  ;;  %v4803_v20 = vld [vmem:[#allocation2 + $0x34] sm:$0x1] }
  0xd6   : > { %v1180_v33 = vshll.u32 %v4803_v20, 16  ;;  %v1163_v40 = vor.u32 %v1162_v19, %v1159_v21  ;;  %v1187_v41 = vrot.slane %v1185_v24, 4  ;;  %v3840_v19 = vrot.slane %v1316_v17, 9 }
  0xd7   : > { %v1617_v17 = vshll.u32 %v4873_v10, 16 }
  0xd8   : > { %v1182_v51 = vrot.slane %v1180_v33, 5  ;;  %v1164_v56 = vrot.slane %v1163_v40, 4  ;;  %v1191_v9 = vor.u32 %v1190_v42, %v1187_v41  ;;  %v1349_v7 = vsel %vm4734_vm15, %v3840_v19, %v1348_v6 }
  0xd9   : > { %v1364_v41 = vrot.slane %v4812_v53, 5  ;;  %v3845_v42 = vrot.slane %v1321_v38, 9  ;;  %v1591_v53 = vld [vmem:[#allocation2 + $0x10] sm:$0xf]  ;;  %v4889_v38 = vld [vmem:[#allocation2 + $0x2c] sm:$0x1] }
  0xda   : > { %v1192_v3 = vrot.slane %v1191_v9, 4  ;;  %v1611_v58 = vshll.u32 %v1591_v53, 16 }
  0xdb   : > { %4140 = vmatmul.mubr.msk.bf16.gmra.mrb[4].mxu0 %vm623_vm12, %v3815_v39  ;;  %v1150_v39 = vrot.slane %v1149_v63, 4  ;;  %v1319_v63 = vld [vmem:[#allocation2 + $0x30] sm:$0xe] }
  0xdc   : > { %4145 = vmatprep.mubr.msk.bf16.mxu0 %vm623_vm12, %v4469_v45  ;;  %v1204_v45 = vrot.slane %v1202_v13, 5  ;;  %v1197_v57 = vsel %vm4657_vm11, %v1192_v3, %v1196_v1  ;;  %v1352_v13 = vrot.slane %v4790_v8, 5  ;;  %v3843_v33 = vrot.slane %v1319_v63, 9  ;;  %v4883_v63 = vld [vmem:[%s5355_s1 + $0x10] sm:$0x3] }
  0xdd   : > { %v1636_v3 = vshrl.u32 %v1595_v60, 16 }
  0xde   : > { %v1205_v59 = vor.u32 %v1204_v45, %v1201_v44  ;;  %v1368_v44 = vrot.slane %v4816_v52, 5  ;;  %v3864_v45 = vld [vmem:[%s5355_s1 + $0xe] sm:$0x3]  ;;  %v1608_v52 = vshrl.u32 %v1591_v53, 16 }
  0xe0   : > { %v1206_v4 = vrot.slane %v1205_v59, 4  ;;  %v1610_v1 = vrot.slane %v1608_v52, 4 }
  0xe2   : > { %v1211_v62 = vsel %vm4657_vm11, %v1206_v4, %v1210_v5  ;;  %v1639_v4 = vshll.u32 %v1595_v60, 16 }
  0xe3   : > { %4146 = vmatmul.mubr.msk.bf16.vlgmr.msra.gmra.mrb[0].mxu0 %vm623_vm12, %v4470_v61  ;;  %v1183_v61 = vsel %vm4657_vm11, %v1178_v50, %v1182_v51  ;;  %v3833_v21 = vcombine.low %v1197_v57, %v1211_v62  ;;  %v1369_v51 = vsel %vm4734_vm15, %v3845_v42, %v1368_v44  ;;  %v1746_v62 = vsel %vm636_vm2, %v3864_v45, 0  ;;  %v4897_v44 = vld [vmem:[#allocation2 + $0x34] sm:$0x1] }
  0xe4   : > { %4154 = vmatpush3.bf16.msra.mxu0 %v1239_v35  ;;  %4149 = vmatprep.mubr.msk.bf16.mxu0 %vm623_vm12, %v4471_v0  ;;  %v1155_v35 = vsel %vm4657_vm11, %v1150_v39, %v1154_v36  ;;  %v1169_v0 = vsel %vm4657_vm11, %v1164_v56, %v1168_v43  ;;  %v1360_v36 = vrot.slane %v4803_v20, 5  ;;  %v1516_v39 = vsel %vm636_vm2, %v3855_v11, 0 }
  0xe5   : > { %4426 = vmatprep.subr.msk.bf16.mxu0 %vm636_vm2, %v4788_v54  ;;  %v3831_v28 = vcombine.low %v1141_v55, %v1155_v35  ;;  %v3832_v2 = vcombine.low %v1169_v0, %v1183_v61  ;;  %v1344_v54 = vrot.slane %v4779_v47, 5  ;;  %v1318_v47 = vld [vmem:[#allocation2 + $0x28] sm:$0xe]  ;;  %v3844_v20 = vrot.slane %v1320_v49, 9  ;;  %v4473_v35 = vld [vmem:[#allocation2 + $0x10] ss:$8 sps:$4 sm:$0xff]  }
  0xe6   : > { %v3842_v27 = vrot.slane %v1318_v47, 9  ;;  %v1622_v55 = vshrl.u32 %v1593_v30, 16  ;;  %v1625_v56 = vshll.u32 %v1593_v30, 16  ;;  %v1597_v61 = vld [vmem:[#allocation2 + $0x28] sm:$0xf]  ;;  %v1641_v19 = vrot.slane %v1639_v4, 5 }
  0xe7   : > { %v1345_v46 = vsel %vm4734_vm15, %v3839_v15, %v1344_v54  ;;  %v1365_v50 = vsel %vm4734_vm15, %v3844_v20, %v1364_v41  ;;  %v4875_v0 = vld [vmem:[#allocation2 + $0x1c] sm:$0x1]  ;;  %v1653_v12 = vshll.u32 %v1597_v61, 16  ;;  %v1619_v49 = vrot.slane %v1617_v17, 5 }
  0xe8   : > { %v3847_v24 = vcombine.low %v1341_v18, %v1345_v46  ;;  %v1357_v8 = vsel %vm4734_vm15, %v3842_v27, %v1356_v32  ;;  %v3850_v43 = vcombine.low %v1365_v50, %v1369_v51  ;;  %v1624_v9 = vrot.slane %v1622_v55, 4 }
  0xe9   : > { %v1627_v59 = vrot.slane %v1625_v56, 5  ;;  %v1631_v18 = vshll.u32 %v4875_v0, 16  ;;  %v1706_v46 = vshrl.u32 %v1605_v22, 16  ;;  %v1709_v27 = vshll.u32 %v1605_v22, 16 }
  0xea   : > { %v1673_v53 = vshll.u32 %v4897_v44, 16 }
  0xeb   : > { %4150 = vmatmul.mubr.msk.bf16.gmra.mrb[4].mxu0 %vm623_vm12, %v4472_v25  ;;  %v1353_v25 = vsel %vm4734_vm15, %v3841_v26, %v1352_v13  ;;  %v1628_v5 = vor.u32 %v1627_v59, %v1624_v9  ;;  %v1655_v13 = vrot.slane %v1653_v12, 5  ;;  %v1711_v52 = vrot.slane %v1709_v27, 5 }
  0xec   : > { %4155 = vmatprep.mubr.msk.bf16.mxu0 %vm623_vm12, %v3830_v37  ;;  %v1361_v37 = vsel %vm4734_vm15, %v3843_v33, %v1360_v36  ;;  %v3848_v31 = vcombine.low %v1349_v7, %v1353_v25  ;;  %v1603_v25 = vld [vmem:[#allocation2 + $0x40] sm:$0xf] }
  0xed   : > { %v3849_v40 = vcombine.low %v1357_v8, %v1361_v37  ;;  %v1629_v6 = vrot.slane %v1628_v5, 4  ;;  %v1633_v8 = vrot.slane %v1631_v18, 5  ;;  %v4887_v37 = vld [vmem:[#allocation2 + $0x24] sm:$0x1]  ;;  %v1692_v30 = vshrl.u32 %v1603_v25, 16 }
  0xee   : > { %v1645_v20 = vshll.u32 %v4887_v37, 16  ;;  %v1695_v50 = vshll.u32 %v1603_v25, 16  ;;  %v1604_v5 = vld [vmem:[#allocation2 + $0x44] sm:$0x1]  ;;  %v1823_v25 = vld [vmem:[#allocation2 + $0x20] sm:$0xe] }
  0xef   : > { %v1634_v41 = vsel %vm4657_vm11, %v1629_v6, %v1633_v8  ;;  %v1701_v12 = vshll.u32 %v1604_v5, 16  ;;  %v1824_v8 = vld [vmem:[#allocation2 + $0x28] sm:$0xe] }
  0xf0   : > { %v1647_v59 = vrot.slane %v1645_v20, 5 }
  0xf3   : > { %4156 = vmatmul.mubr.msk.bf16.vlgmr.msra.gmra.mrb[0].mxu0 %vm623_vm12, %v3831_v28  ;;  %v1599_v28 = vld [vmem:[#allocation2 + $0x30] sm:$0xf] }
  0xf4   : > { %4164 = vmatpush3.bf16.msra.mxu0 %v1397_v48  ;;  %4159 = vmatprep.mubr.msk.bf16.mxu0 %vm623_vm12, %v3832_v2  ;;  %v1601_v48 = vld [vmem:[#allocation2 + $0x38] sm:$0xf]  ;;  %v1613_v2 = vrot.slane %v1611_v58, 5  ;;  %v1664_v14 = vshrl.u32 %v1599_v28, 16  ;;  %v1667_v15 = vshll.u32 %v1599_v28, 16  ;;  %v1694_v28 = vrot.slane %v1692_v30, 4 }
  0xf5   : > { %4427 = vmatprep.subr.msk.bf16.mxu0 %vm636_vm2, %v3855_v11  ;;  %v1650_v11 = vshrl.u32 %v1597_v61, 16  ;;  %v1678_v54 = vshrl.u32 %v1601_v48, 16  ;;  %v1681_v57 = vshll.u32 %v1601_v48, 16  ;;  %v4476_v58 = vld [vmem:[#allocation2 + $0x40] ss:$8 sps:$4 sm:$0xff]   ;;  %v1697_v48 = vrot.slane %v1695_v50, 5 }
  0xf6   : > { %v1614_v47 = vor.u32 %v1613_v2, %v1610_v1  ;;  %v1666_v32 = vrot.slane %v1664_v14, 4  ;;  %v1669_v33 = vrot.slane %v1667_v15, 5  ;;  %v1675_v2 = vrot.slane %v1673_v53, 5 }
  0xf7   : > { %v1652_v26 = vrot.slane %v1650_v11, 4  ;;  %v1680_v36 = vrot.slane %v1678_v54, 4  ;;  %v1683_v7 = vrot.slane %v1681_v57, 5  ;;  %v1606_v11 = vld [vmem:[#allocation2 + $0x4c] sm:$0x1]  ;;  %v1698_v57 = vor.u32 %v1697_v48, %v1694_v28 }
  0xf8   : > { %v1670_v51 = vor.u32 %v1669_v33, %v1666_v32  ;;  %v1715_v14 = vshll.u32 %v1606_v11, 16  ;;  %v1851_v32 = vrot.slane %v4875_v0, 5  ;;  %v1859_v30 = vrot.slane %v4889_v38, 5  ;;  %v3899_v48 = vld [vmem:[%s5357_s3 + $0x4] sm:$0xf] }
  0xf9   : > { %v1656_v42 = vor.u32 %v1655_v13, %v1652_v26  ;;  %v1684_v55 = vor.u32 %v1683_v7, %v1680_v36  ;;  %v1821_v13 = vld [vmem:[#allocation2 + $0x10] sm:$0xe]  ;;  %v1847_v36 = vrot.slane %v4873_v10, 5  ;;  %v1855_v10 = vrot.slane %v4887_v37, 5  ;;  %v1827_v37 = vld [vmem:[#allocation2 + $0x40] sm:$0xe] }
  0xfa   : > { %v1671_v1 = vrot.slane %v1670_v51, 4  ;;  %v1717_v26 = vrot.slane %v1715_v14, 5  ;;  %v3873_v33 = vrot.slane %v1821_v13, 9  ;;  %v1863_v51 = vrot.slane %v4897_v44, 5 }
  0xfb   : > { %4160 = vmatmul.mubr.msk.bf16.gmra.mrb[4].mxu0 %vm623_vm12, %v3833_v21  ;;  %v1638_v21 = vrot.slane %v1636_v3, 4  ;;  %v1657_v22 = vrot.slane %v1656_v42, 4  ;;  %v1685_v3 = vrot.slane %v1684_v55, 4  ;;  %v3876_v42 = vrot.slane %v1824_v8, 9 }
  0xfc   : > { %4165 = vmatprep.mubr.msk.bf16.mxu0 %vm623_vm12, %v3847_v24  ;;  %v4475_v24 = vld [vmem:[#allocation2 + $0x30] ss:$8 sps:$4 sm:$0xff]   ;;  %v1676_v17 = vsel %vm4657_vm11, %v1671_v1, %v1675_v2  ;;  %v1848_v20 = vsel %vm4734_vm15, %v3873_v33, %v1847_v36  ;;  %v4958_v2 = vld [vmem:[%s5357_s3] sm:$0xf] }
 0x103   : > { %4166 = vmatmul.mubr.msk.bf16.vlgmr.msra.gmra.mrb[0].mxu0 %vm623_vm12, %v3848_v31  ;;  %v1615_v31 = vrot.slane %v1614_v47, 4  ;;  %v1904_v47 = vsel %vm636_vm2, %v4883_v63, 0 }
 0x104   : > { %4174 = vmatpush3.bf16.msra.mxu0 %v1516_v39  ;;  %4169 = vmatprep.mubr.msk.bf16.mxu0 %vm623_vm12, %v3849_v40  ;;  %v1642_v39 = vor.u32 %v1641_v19, %v1638_v21  ;;  %v1659_v40 = vshll.u32 %v4889_v38, 16  ;;  %v1703_v21 = vrot.slane %v1701_v12, 5 }
 0x105   : > { %4428 = vmatprep.subr.msk.bf16.mxu0 %vm636_vm2, %v3864_v45  ;;  %v4899_v45 = vld [vmem:[#allocation2 + $0x3c] sm:$0x1] }
 0x106   : > { %v1687_v56 = vshll.u32 %v4899_v45, 16  ;;  %v1643_v9 = vrot.slane %v1642_v39, 4  ;;  %v1661_v60 = vrot.slane %v1659_v40, 5  ;;  %v1826_v39 = vld [vmem:[#allocation2 + $0x38] sm:$0xe]  ;;  %v3875_v40 = vrot.slane %v1823_v25, 9 }
 0x107   : > { %v3878_v53 = vrot.slane %v1826_v39, 9  ;;  %v1867_v55 = vrot.slane %v4899_v45, 5  ;;  %v1871_v45 = vrot.slane %v1604_v5, 5  ;;  %v4967_v5 = vld [vmem:[#allocation2] sm:$0xf] }
 0x108   : > { %v1689_v4 = vrot.slane %v1687_v56, 5  ;;  %v1648_v15 = vsel %vm4657_vm11, %v1643_v9, %v1647_v59  ;;  %v1662_v54 = vsel %vm4657_vm11, %v1657_v22, %v1661_v60  ;;  %v1856_v56 = vsel %vm4734_vm15, %v3875_v40, %v1855_v10 }
 0x109   : > { %v1875_v60 = vrot.slane %v1606_v11, 5 }
 0x10a   : > { %v1690_v18 = vsel %vm4657_vm11, %v1685_v3, %v1689_v4  ;;  %v4965_v3 = vld [vmem:[%s5356_s2] ss:$0 sm:$0xff] }
 0x10b   : > { %4170 = vmatmul.mubr.msk.bf16.gmra.mrb[4].mxu0 %vm623_vm12, %v3850_v43  ;;  %v1708_v43 = vrot.slane %v1706_v46, 4  ;;  %v1822_v46 = vld [vmem:[#allocation2 + $0x18] sm:$0xe]  ;;  %v3867_v19 = vcombine.low %v1676_v17, %v1690_v18  ;;  %v2183_v17 = vshrl.u32 %v4967_v5, 16  ;;  %v2186_v18 = vshll.u32 %v4967_v5, 16 }
 0x10c   : > { %4175 = vmatprep.mubr.msk.bf16.mxu0 %vm623_vm12, %v4473_v35  ;;  %v1620_v35 = vsel %vm4657_vm11, %v1615_v31, %v1619_v49  ;;  %v3874_v27 = vrot.slane %v1822_v46, 9  ;;  %v1825_v31 = vld [vmem:[#allocation2 + $0x30] sm:$0xe] }
 0x10d   : > { %v3865_v61 = vcombine.low %v1620_v35, %v1634_v41  ;;  %v3877_v50 = vrot.slane %v1825_v31, 9  ;;  %v3879_v35 = vrot.slane %v1827_v37, 9  ;;  %v4980_v33 = vrot.slane %v2186_v18, 5 }
 0x10e   : > { %v1852_v49 = vsel %vm4734_vm15, %v3874_v27, %v1851_v32  ;;  %v4978_v32 = vrot.slane %v2183_v17, 4 }
 0x10f   : > { %v3882_v41 = vcombine.low %v1848_v20, %v1852_v49  ;;  %v1864_v38 = vsel %vm4734_vm15, %v3877_v50, %v1863_v51 }
 0x113   : > { %4176 = vmatmul.mubr.msk.bf16.vlgmr.msra.gmra.mrb[0].mxu0 %vm623_vm12, %v4474_v34  ;;  %v3866_v34 = vcombine.low %v1648_v15, %v1662_v54 }
 0x114   : > { %4184 = vmatpush3.bf16.msra.mxu0 %v1746_v62  ;;  %4179 = vmatprep.mubr.msk.bf16.mxu0 %vm623_vm12, %v4475_v24  ;;  %v1712_v62 = vor.u32 %v1711_v52, %v1708_v43  ;;  %v1699_v24 = vrot.slane %v1698_v57, 4  ;;  %v1860_v43 = vsel %vm4734_vm15, %v3876_v42, %v1859_v30  ;;  %v1868_v52 = vsel %vm4734_vm15, %v3878_v53, %v1867_v55 }
 0x115   : > { %4429 = vmatprep.subr.msk.bf16.mxu0 %vm636_vm2, %v4883_v63  ;;  %v3883_v44 = vcombine.low %v1856_v56, %v1860_v43  ;;  %v3884_v9 = vcombine.low %v1864_v38, %v1868_v52  ;;  %vm2321_vm2 = vcmask 1043456   ;;  %v2129_v56 = vld [vmem:[#allocation2 + $0x18] sm:$0xf]  ;;  %v2132_v52 = vld [vmem:[#allocation2 + $0x1c] sm:$0x1] }
 0x116   : > { %v1713_v6 = vrot.slane %v1712_v62, 4  ;;  %v1704_v63 = vsel %vm4657_vm11, %v1699_v24, %v1703_v21  ;;  %4430 = vmatprep.subr.msk.bf16.mxu1 %vm2321_vm2, %v3899_v48  ;;  %v2323_v1 = vsel %vm2321_vm2, %v3899_v48, 0 }
 0x117   : > { %4204 = vmatpush3.bf16.msra.mxu1 %v2323_v1  ;;  %v2135_v1 = vld [vmem:[#allocation2 + $0x20] sm:$0xf] }
 0x118   : > { %v1718_v7 = vsel %vm4657_vm11, %v1713_v6, %v1717_v26  ;;  %4431 = vmatprep.subr.msk.bf16.mxu1 %vm2321_vm2, %v4958_v2 }
 0x119   : > { %v3868_v0 = vcombine.low %v1704_v63, %v1718_v7 }
 0x11b   : > { %4180 = vmatmul.mubr.msk.bf16.gmra.mrb[4].mxu0 %vm623_vm12, %v4476_v58  ;;  %v1828_v58 = vld [vmem:[#allocation2 + $0x48] sm:$0xe] }
 0x11c   : > { %4185 = vmatprep.mubr.msk.bf16.mxu0 %vm623_vm12, %v3865_v61  ;;  %v3880_v59 = vrot.slane %v1828_v58, 9  ;;  %v1872_v61 = vsel %vm4734_vm15, %v3879_v35, %v1871_v45 }
 0x11e   : > { %v1876_v22 = vsel %vm4734_vm15, %v3880_v59, %v1875_v60  ;;  %v2120_v60 = vld [vmem:[#allocation2 + $0xc] sm:$0x1] }
 0x11f   : > { %v3885_v28 = vcombine.low %v1872_v61, %v1876_v22 }
 0x123   : > { %4186 = vmatmul.mubr.msk.bf16.vlgmr.msra.gmra.mrb[0].mxu0 %vm623_vm12, %v3866_v34 }
 0x124   : > { %4194 = vmatpush3.bf16.msra.mxu0 %v1904_v47  ;;  %4189 = vmatprep.mubr.msk.bf16.mxu0 %vm623_vm12, %v3867_v19  ;;  %v4975_v19 = vld [vmem:[#allocation2 + $0x4] sm:$0x1] }
 0x125   : > { %v2192_v26 = vshll.u32 %v4975_v19, 16 }
 0x12b   : > { %4190 = vmatmul.mubr.msk.bf16.gmra.mrb[4].mxu0 %vm623_vm12, %v3868_v0 }
 0x12c   : > { %4195 = vmatprep.mubr.msk.bf16.mxu0 %vm623_vm12, %v3882_v41 }
 0x133   : > { %4196 = vmatmul.mubr.msk.bf16.vlgmr.msra.gmra.mrb[0].mxu0 %vm623_vm12, %v3883_v44 }
 0x134   : > { %4199 = vmatprep.mubr.msk.bf16.mxu0 %vm623_vm12, %v3884_v9 }
 0x13b   : > { %4200 = vmatmul.mubr.msk.bf16.gmra.mrb[4].mxu0 %vm623_vm12, %v3885_v28 }
 0x206   : > { %v4197_v4 = vpop.f32.mrb[0].mxu0 }
 0x207   : > { %v1988_v11 = vadd.f32 %v4197_v4, %v4965_v3  ;;  %v1940_v12 = vpop.f32.mrb[1].mxu0  ;;  %v2138_v4 = vld [vmem:[#allocation2 + $0x24] sm:$0x1] }
 0x208   : > { %v1986_v14 = vadd.f32 %v4965_v3, %v1940_v12  ;;  %v4198_v15 = vpop.f32.mrb[2].mxu0 }
 0x209   : > { %v1996_v54 = vmax.f32 %v1988_v11, 0.0  ;;  %v1989_v57 = vadd.f32 %v4198_v15, %v4965_v3  ;;  %v1943_v62 = vpop.f32.mrb[3].mxu0 }
 0x20a   : > { %v1994_v46 = vmax.f32 %v1986_v14, 0.0  ;;  %v1987_v34 = vadd.f32 %v4965_v3, %v1943_v62 }
 0x20b   : > { %v4017_v47 = vpack.c.bf16 %v1996_v54, %v1996_v54  ;;  %v1997_v21 = vmax.f32 %v1989_v57, 0.0  ;;  %v2123_v54 = vld [vmem:[#allocation2 + $0x10] sm:$0xf]  ;;  %v2126_v57 = vld [vmem:[#allocation2 + $0x14] sm:$0x1] }
 0x20c   : > { %v4015_v24 = vpack.c.bf16 %v1994_v46, %v1994_v46  ;;  %v1995_v6 = vmax.f32 %v1987_v34, 0.0 }
 0x20d   : > { %v2051_v13 = vshrl.u32 %v4017_v47, 16  ;;  %v4018_v27 = vpack.c.bf16 %v1997_v21, %v1997_v21  ;;  %v2054_v36 = vshll.u32 %v4017_v47, 16 }
 0x20e   : > { %v2035_v63 = vshrl.u32 %v4015_v24, 16  ;;  %v2038_v7 = vshll.u32 %v4015_v24, 16  ;;  %v4016_v25 = vpack.c.bf16 %v1995_v6, %v1995_v6  ;;  %v4201_v49 = vpop.f32.mrb[4].mxu0 }
 0x20f   : > { %v2053_v8 = vrot.slane %v2051_v13, 7  ;;  %v2059_v39 = vshrl.u32 %v4018_v27, 16  ;;  %v2062_v0 = vshll.u32 %v4018_v27, 16  ;;  %v1992_v20 = vadd.f32 %v4201_v49, %v4965_v3  ;;  %v1956_v40 = vpop.f32.mrb[5].mxu0 }
 0x210   : > { %v2037_v10 = vrot.slane %v2035_v63, 7  ;;  %v2043_v42 = vshrl.u32 %v4016_v25, 16  ;;  %v2046_v30 = vshll.u32 %v4016_v25, 16  ;;  %v1990_v50 = vadd.f32 %v4965_v3, %v1956_v40  ;;  %v4202_v51 = vpop.f32.mrb[6].mxu0  ;;  %v2156_v25 = vld [vmem:[#allocation2 + $0x3c] sm:$0x1] }
 0x211   : > { %v2056_v53 = vor.u32 %v2054_v36, %v2053_v8  ;;  %v2057_v55 = vrot.slane %v2053_v8, 4  ;;  %v2061_v43 = vrot.slane %v2059_v39, 7  ;;  %v2000_v37 = vmax.f32 %v1992_v20, 0.0  ;;  %v1959_v38 = vpop.f32.mrb[7].mxu0 }
 0x212   : > { %v2040_v58 = vor.u32 %v2038_v7, %v2037_v10  ;;  %v2041_v44 = vrot.slane %v2037_v10, 4  ;;  %v2045_v35 = vrot.slane %v2043_v42, 7  ;;  %v1998_v9 = vmax.f32 %v1990_v50, 0.0  ;;  %v2153_v7 = vld [vmem:[#allocation2 + $0x38] sm:$0xf] }
 0x213   : > { %v2130_v45 = vsel %vm4984_vm3, %v2056_v53, %v2129_v56  ;;  %v2133_v59 = vsel %vm4991_vm5, %v2057_v55, %v2132_v52  ;;  %v2064_v61 = vor.u32 %v2062_v0, %v2061_v43  ;;  %v2065_v22 = vrot.slane %v2061_v43, 4  ;;  %v2141_v42 = vld [vmem:[#allocation2 + $0x28] sm:$0xf] }
 0x214   : > { %2131 = vst [vmem:[#allocation2 + $0x18] sm:$0xf] %v2130_v45  ;;  %2134 = vst [vmem:[#allocation2 + $0x1c] sm:$0x1] %v2133_v59  ;;  %v2116_v28 = vsel %vm4984_vm3, %v2040_v58, %v4763_v23  ;;  %v2121_v48 = vsel %vm4991_vm5, %v2041_v44, %v2120_v60  ;;  %v2048_v11 = vor.u32 %v2046_v30, %v2045_v35  ;;  %v2049_v12 = vrot.slane %v2045_v35, 4 }
 0x215   : > { %2117 = vst [vmem:[#allocation2 + $0x8] sm:$0xf] %v2116_v28  ;;  %2122 = vst [vmem:[#allocation2 + $0xc] sm:$0x1] %v2121_v48  ;;  %v2136_v14 = vsel %vm4984_vm3, %v2064_v61, %v2135_v1  ;;  %v2139_v15 = vsel %vm4991_vm5, %v2065_v22, %v2138_v4  ;;  %v4021_v62 = vpack.c.bf16 %v2000_v37, %v2000_v37  ;;  %v2144_v30 = vld [vmem:[#allocation2 + $0x2c] sm:$0x1] }
 0x216   : > { %v4019_v17 = vpack.c.bf16 %v1998_v9, %v1998_v9  ;;  %2137 = vst [vmem:[#allocation2 + $0x20] sm:$0xf] %v2136_v14  ;;  %2140 = vst [vmem:[#allocation2 + $0x24] sm:$0x1] %v2139_v15  ;;  %v2124_v23 = vsel %vm4984_vm3, %v2048_v11, %v2123_v54  ;;  %v2127_v18 = vsel %vm4991_vm5, %v2049_v12, %v2126_v57  ;;  %v2159_v9 = vld [vmem:[#allocation2 + $0x40] sm:$0xf] }
 0x217   : > { %v1993_v46 = vadd.f32 %v4202_v51, %v4965_v3  ;;  %v1991_v34 = vadd.f32 %v4965_v3, %v1959_v38  ;;  %2125 = vst [vmem:[#allocation2 + $0x10] sm:$0xf] %v2124_v23  ;;  %2128 = vst [vmem:[#allocation2 + $0x14] sm:$0x1] %v2127_v18  ;;  %v2083_v47 = vshrl.u32 %v4021_v62, 16  ;;  %v2086_v27 = vshll.u32 %v4021_v62, 16 }
 0x218   : > { %v2067_v21 = vshrl.u32 %v4019_v17, 16  ;;  %v2070_v63 = vshll.u32 %v4019_v17, 16  ;;  %v2189_v39 = vor.u32 %v4980_v33, %v4978_v32  ;;  %v5019_v3 = vrot.slane %v2192_v26, 5  ;;  %v2162_v45 = vld [vmem:[#allocation2 + $0x44] sm:$0x1] }
 0x219   : > { %v2001_v24 = vmax.f32 %v1993_v46, 0.0  ;;  %v1999_v6 = vmax.f32 %v1991_v34, 0.0  ;;  %v2085_v13 = vrot.slane %v2083_v47, 7  ;;  %v2147_v59 = vld [vmem:[#allocation2 + $0x30] sm:$0xf] }
 0x21a   : > { %v2069_v36 = vrot.slane %v2067_v21, 7  ;;  %v2190_v60 = vrot.slane %v2189_v39, 4  ;;  %v2150_v15 = vld [vmem:[#allocation2 + $0x34] sm:$0x1] }
 0x21b   : > { %v4022_v49 = vpack.c.bf16 %v2001_v24, %v2001_v24  ;;  %v4020_v8 = vpack.c.bf16 %v1999_v6, %v1999_v6  ;;  %v2088_v0 = vor.u32 %v2086_v27, %v2085_v13  ;;  %v2089_v20 = vrot.slane %v2085_v13, 4  ;;  %v5040_v12 = vld [vmem:[#allocation2 + $0x18] sm:$0xf]  ;;  %v5052_v34 = vld [vmem:[#allocation2 + $0x1c] sm:$0x1] }
 0x21c   : > { %v2072_v40 = vor.u32 %v2070_v63, %v2069_v36  ;;  %v2073_v10 = vrot.slane %v2069_v36, 4  ;;  %v5021_v56 = vld [vmem:[#allocation2 + $0x8] sm:$0xf]  ;;  %v5031_v37 = vld [vmem:[#allocation2 + $0xc] sm:$0x1]  ;;  %v2225_v6 = vshrl.u32 %v5040_v12, 16  ;;  %v2195_v31 = vsel %vm4657_vm11, %v2190_v60, %v5019_v3 }
 0x21d   : > { %v2091_v50 = vshrl.u32 %v4022_v49, 16  ;;  %v2094_v51 = vshll.u32 %v4022_v49, 16  ;;  %v2075_v53 = vshrl.u32 %v4020_v8, 16  ;;  %v2078_v55 = vshll.u32 %v4020_v8, 16  ;;  %v5056_v13 = vld [vmem:[#allocation2 + $0x20] sm:$0xf] }
 0x21e   : > { %v2154_v43 = vsel %vm4984_vm3, %v2088_v0, %v2153_v7  ;;  %v2157_v32 = vsel %vm4991_vm5, %v2089_v20, %v2156_v25  ;;  %v2142_v26 = vsel %vm4984_vm3, %v2072_v40, %v2141_v42  ;;  %v2145_v33 = vsel %vm4991_vm5, %v2073_v10, %v2144_v30  ;;  %v5035_v35 = vld [vmem:[#allocation2 + $0x10] sm:$0xf]  ;;  %v5042_v14 = vld [vmem:[#allocation2 + $0x14] sm:$0x1]  ;;  %v5069_v10 = vld [vmem:[#allocation2 + $0x24] sm:$0x1] }
 0x21f   : > { %2155 = vst [vmem:[#allocation2 + $0x38] sm:$0xf] %v2154_v43  ;;  %2158 = vst [vmem:[#allocation2 + $0x3c] sm:$0x1] %v2157_v32  ;;  %v2093_v38 = vrot.slane %v2091_v50, 7  ;;  %v2077_v52 = vrot.slane %v2075_v53, 7 }
 0x220   : > { %2143 = vst [vmem:[#allocation2 + $0x28] sm:$0xf] %v2142_v26  ;;  %2146 = vst [vmem:[#allocation2 + $0x2c] sm:$0x1] %v2145_v33  ;;  %v2197_v58 = vshrl.u32 %v5021_v56, 16  ;;  %v2200_v44 = vshll.u32 %v5021_v56, 16 }
 0x221   : > { %v2206_v61 = vshll.u32 %v5031_v37, 16  ;;  %v2211_v22 = vshrl.u32 %v5035_v35, 16  ;;  %v2214_v28 = vshll.u32 %v5035_v35, 16  ;;  %v2096_v48 = vor.u32 %v2094_v51, %v2093_v38 }
 0x222   : > { %v2097_v1 = vrot.slane %v2093_v38, 4  ;;  %v2080_v4 = vor.u32 %v2078_v55, %v2077_v52  ;;  %v2081_v11 = vrot.slane %v2077_v52, 4  ;;  %v2199_v54 = vrot.slane %v2197_v58, 4 }
 0x223   : > { %v2202_v57 = vrot.slane %v2200_v44, 5  ;;  %v2213_v62 = vrot.slane %v2211_v22, 4  ;;  %v2160_v17 = vsel %vm4984_vm3, %v2096_v48, %v2159_v9  ;;  %v2216_v21 = vrot.slane %v2214_v28, 5 }
 0x224   : > { %v2163_v23 = vsel %vm4991_vm5, %v2097_v1, %v2162_v45  ;;  %v2148_v18 = vsel %vm4984_vm3, %v2080_v4, %v2147_v59  ;;  %v2151_v46 = vsel %vm4991_vm5, %v2081_v11, %v2150_v15  ;;  %2161 = vst [vmem:[#allocation2 + $0x40] sm:$0xf] %v2160_v17  ;;  %v2220_v24 = vshll.u32 %v5042_v14, 16  ;;  %v3924_v4 = vld [vmem:[%s5357_s3 + $0x8] sm:$0xf] }
 0x225   : > { %2164 = vst [vmem:[#allocation2 + $0x44] sm:$0x1] %v2163_v23  ;;  %2149 = vst [vmem:[#allocation2 + $0x30] sm:$0xf] %v2148_v18  ;;  %v2203_v47 = vor.u32 %v2202_v57, %v2199_v54  ;;  %v2208_v41 = vrot.slane %v2206_v61, 5  ;;  %v2228_v27 = vshll.u32 %v5040_v12, 16  ;;  %v2217_v63 = vor.u32 %v2216_v21, %v2213_v62 }
 0x226   : > { %2152 = vst [vmem:[#allocation2 + $0x34] sm:$0x1] %v2151_v46  ;;  %v2227_v7 = vrot.slane %v2225_v6, 4  ;;  %v2234_v25 = vshll.u32 %v5052_v34, 16  ;;  %v2239_v39 = vshrl.u32 %v5056_v13, 16  ;;  %v2242_v0 = vshll.u32 %v5056_v13, 16 }
 0x227   : > { %v2204_v36 = vrot.slane %v2203_v47, 4  ;;  %v5063_v49 = vld [vmem:[#allocation2 + $0x28] sm:$0xf]  ;;  %v2230_v8 = vrot.slane %v2228_v27, 5  ;;  %v2218_v3 = vrot.slane %v2217_v63, 4  ;;  %v2222_v40 = vrot.slane %v2220_v24, 5 }
 0x228   : > { %v2253_v42 = vshrl.u32 %v5063_v49, 16  ;;  %v5072_v51 = vld [vmem:[#allocation2 + $0x2c] sm:$0x1]  ;;  %v2241_v53 = vrot.slane %v2239_v39, 4  ;;  %v2244_v55 = vrot.slane %v2242_v0, 5  ;;  %v2236_v43 = vrot.slane %v2234_v25, 5 }
 0x229   : > { %v2209_v20 = vsel %vm4657_vm11, %v2204_v36, %v2208_v41  ;;  %v2231_v50 = vor.u32 %v2230_v8, %v2227_v7  ;;  %v2423_v32 = vsel %vm2321_vm2, %v4958_v2, 0  ;;  %v2256_v33 = vshll.u32 %v5063_v49, 16  ;;  %v5077_v38 = vld [vmem:[#allocation2 + $0x38] sm:$0xf]  ;;  %v5096_v54 = vld [vmem:[#allocation2 + $0x3c] sm:$0x1] }
 0x22a   : > { %v3900_v30 = vcombine.low %v2195_v31, %v2209_v20  ;;  %v2255_v26 = vrot.slane %v2253_v42, 4  ;;  %v2223_v52 = vsel %vm4657_vm11, %v2218_v3, %v2222_v40  ;;  %v2245_v44 = vor.u32 %v2244_v55, %v2241_v53  ;;  %v2490_v42 = vld [vmem:[#allocation2] sm:$0xe] }
 0x22b   : > { %v2232_v58 = vrot.slane %v2231_v50, 4  ;;  %v2248_v9 = vshll.u32 %v5069_v10, 16  ;;  %v2258_v59 = vrot.slane %v2256_v33, 5  ;;  %v2262_v60 = vshll.u32 %v5072_v51, 16 }
 0x22c   : > { %4205 = vmatprep.mubr.msk.bf16.mxu1 %vm2308_vm0, %v3900_v30  ;;  %v5083_v45 = vld [vmem:[#allocation2 + $0x30] sm:$0xf]  ;;  %v2246_v48 = vrot.slane %v2245_v44, 4  ;;  %v2281_v1 = vshrl.u32 %v5077_v38, 16  ;;  %v2284_v18 = vshll.u32 %v5077_v38, 16  ;;  %v2290_v31 = vshll.u32 %v5096_v54, 16 }
 0x22d   : > { %v5086_v2 = vld [vmem:[#allocation2 + $0x34] sm:$0x1]  ;;  %v2267_v61 = vshrl.u32 %v5083_v45, 16  ;;  %v2270_v22 = vshll.u32 %v5083_v45, 16  ;;  %v2237_v28 = vsel %vm4657_vm11, %v2232_v58, %v2236_v43  ;;  %v2259_v15 = vor.u32 %v2258_v59, %v2255_v26  ;;  %v2491_v30 = vld [vmem:[#allocation2 + $0x8] sm:$0xe] }
 0x22e   : > { %v3901_v11 = vcombine.low %v2223_v52, %v2237_v28  ;;  %v2276_v17 = vshll.u32 %v5086_v2, 16  ;;  %v2283_v23 = vrot.slane %v2281_v1, 4  ;;  %v2250_v46 = vrot.slane %v2248_v9, 5  ;;  %v3933_v43 = vld [vmem:[%s5357_s3 + $0xc] sm:$0xf] }
 0x22f   : > { %v2269_v57 = vrot.slane %v2267_v61, 4  ;;  %v2272_v62 = vrot.slane %v2270_v22, 5  ;;  %v2260_v47 = vrot.slane %v2259_v15, 4  ;;  %v2264_v21 = vrot.slane %v2262_v60, 5  ;;  %v2494_v44 = vld [vmem:[#allocation2 + $0x20] sm:$0xe] }
 0x230   : > { %4206 = vmatmul.mubr.msk.bf16.vlgmr.msra.gmra.mrb[0].mxu1 %vm2308_vm0, %v3901_v11  ;;  %v2286_v6 = vrot.slane %v2284_v18, 5  ;;  %v2251_v41 = vsel %vm4657_vm11, %v2246_v48, %v2250_v46  ;;  %v2278_v7 = vrot.slane %v2276_v17, 5  ;;  %v2292_v0 = vrot.slane %v2290_v31, 5  ;;  %v2766_v46 = vld [vmem:[#allocation2 + $0x8] sm:$0xf] }
 0x231   : > { %v2273_v24 = vor.u32 %v2272_v62, %v2269_v57  ;;  %4214 = vmatpush3.bf16.msra.mxu1 %v2423_v32  ;;  %v2265_v27 = vsel %vm4657_vm11, %v2260_v47, %v2264_v21  ;;  %v3908_v40 = vcombine.low %v4967_v5, %v5021_v56  ;;  %v3909_v50 = vcombine.low %v5035_v35, %v5040_v12  ;;  %v3942_v57 = vld [vmem:[%s5357_s3 + $0x10] sm:$0xf] }
 0x232   : > { %4432 = vmatprep.subr.msk.bf16.mxu1 %vm2321_vm2, %v3924_v4  ;;  %v3902_v63 = vcombine.low %v2251_v41, %v2265_v27  ;;  %v2287_v25 = vor.u32 %v2286_v6, %v2283_v23  ;;  %v2573_v53 = vsel %vm2321_vm2, %v3924_v4, 0  ;;  %v3910_v55 = vcombine.low %v5056_v13, %v5063_v49  ;;  %v2492_v13 = vld [vmem:[#allocation2 + $0x10] sm:$0xe]  ;;  %v2495_v49 = vld [vmem:[#allocation2 + $0x28] sm:$0xe] }
 0x233   : > { %v2274_v36 = vrot.slane %v2273_v24, 4  ;;  %v2516_v5 = vrot.slane %v4975_v19, 5  ;;  %v2520_v56 = vrot.slane %v5031_v37, 5  ;;  %v3916_v32 = vrot.slane %v2490_v42, 9  ;;  %v2493_v37 = vld [vmem:[#allocation2 + $0x18] sm:$0xe] }
 0x234   : > { %4209 = vmatprep.mubr.msk.bf16.mxu1 %vm2308_vm0, %v3902_v63  ;;  %v2288_v39 = vrot.slane %v2287_v25, 4  ;;  %v3917_v26 = vrot.slane %v2491_v30, 9  ;;  %v3911_v19 = vcombine.low %v5083_v45, %v5077_v38  ;;  %v2524_v33 = vrot.slane %v5042_v14, 5  ;;  %v2496_v45 = vld [vmem:[#allocation2 + $0x30] sm:$0xe] }
 0x235   : > { %v2279_v8 = vsel %vm4657_vm11, %v2274_v36, %v2278_v7  ;;  %v2517_v35 = vsel %vm4734_vm15, %v3916_v32, %v2516_v5  ;;  %v3918_v58 = vrot.slane %v2492_v13, 9  ;;  %v3921_v9 = vrot.slane %v2495_v49, 9  ;;  %v2497_v4 = vld [vmem:[#allocation2 + $0x38] sm:$0xe]  ;;  %v2768_v23 = vld [vmem:[#allocation2 + $0x10] sm:$0xf] }
 0x236   : > { %v2293_v20 = vsel %vm4657_vm11, %v2288_v39, %v2292_v0  ;;  %v2521_v12 = vsel %vm4734_vm15, %v3917_v26, %v2520_v56  ;;  %v2536_v59 = vrot.slane %v5072_v51, 5  ;;  %v2528_v60 = vrot.slane %v5052_v34, 5  ;;  %v4481_v41 = vld [vmem:[#allocation2 + $0x8] ss:$8 sps:$4 sm:$0xff]   ;;  %v2772_v36 = vld [vmem:[#allocation2 + $0x20] sm:$0xf] }
 0x237   : > { %v3903_v3 = vcombine.low %v2279_v8, %v2293_v20  ;;  %v3925_v52 = vcombine.low %v2517_v35, %v2521_v12  ;;  %v3919_v61 = vrot.slane %v2493_v37, 9  ;;  %v3920_v22 = vrot.slane %v2494_v44, 9  ;;  %v2776_v63 = vld [vmem:[#allocation2 + $0x30] sm:$0xf]  ;;  %v2770_v8 = vld [vmem:[#allocation2 + $0x18] sm:$0xf] }
 0x238   : > { %v2532_v28 = vrot.slane %v5069_v10, 5  ;;  %v2525_v38 = vsel %vm4734_vm15, %v3918_v58, %v2524_v33  ;;  %v2537_v14 = vsel %vm4734_vm15, %v3921_v9, %v2536_v59  ;;  %v2691_v51 = vsel %vm2321_vm2, %v3933_v43, 0  ;;  %v5164_v39 = vld [vmem:[#allocation2 + $0x14] sm:$0x1]  ;;  %v4482_v5 = vld [vmem:[#allocation2 + $0x18] ss:$8 sps:$4 sm:$0xff]  }
 0x239   : > { %4210 = vmatmul.mubr.msk.bf16.gmra.mrb[4].mxu1 %vm2308_vm0, %v3903_v3  ;;  %v2529_v48 = vsel %vm4734_vm15, %v3919_v61, %v2528_v60  ;;  %v3922_v15 = vrot.slane %v2496_v45, 9  ;;  %v2540_v10 = vrot.slane %v5086_v2, 5  ;;  %v3923_v62 = vrot.slane %v2497_v4, 9  ;;  %v2774_v3 = vld [vmem:[#allocation2 + $0x28] sm:$0xf] }
 0x23a   : > { %4215 = vmatprep.mubr.msk.bf16.mxu1 %vm2308_vm0, %v3908_v40  ;;  %v3926_v1 = vcombine.low %v2525_v38, %v2529_v48  ;;  %v2533_v34 = vsel %vm4734_vm15, %v3920_v22, %v2532_v28  ;;  %v2544_v17 = vrot.slane %v5096_v54, 5  ;;  %v2797_v2 = vshrl.u32 %v2768_v23, 16  ;;  %v4483_v12 = vld [vmem:[#allocation2 + $0x28] ss:$8 sps:$4 sm:$0xff]   ;;  %v5173_v13 = vld [vmem:[%s5357_s3 + $0x14] sm:$0xf] }
 0x23b   : > { %v3927_v11 = vcombine.low %v2533_v34, %v2537_v14  ;;  %v2541_v18 = vsel %vm4734_vm15, %v3922_v15, %v2540_v10  ;;  %v2800_v47 = vshll.u32 %v2768_v23, 16  ;;  %v2783_v6 = vshrl.u32 %v2766_v46, 16  ;;  %v2780_v44 = vld [vmem:[#allocation2 + $0x40] sm:$0xf]  ;;  %v5178_v9 = vld [vmem:[#allocation2 + $0x24] sm:$0x1] }
 0x23c   : > { %v2545_v21 = vsel %vm4734_vm15, %v3923_v62, %v2544_v17  ;;  %v2786_v31 = vshll.u32 %v2766_v46, 16  ;;  %v2799_v27 = vrot.slane %v2797_v2, 4  ;;  %v2825_v0 = vshrl.u32 %v2772_v36, 16  ;;  %v2778_v14 = vld [vmem:[#allocation2 + $0x38] sm:$0xf] }
 0x23d   : > { %v3928_v24 = vcombine.low %v2541_v18, %v2545_v21  ;;  %v2802_v54 = vrot.slane %v2800_v47, 5  ;;  %v2785_v7 = vrot.slane %v2783_v6, 4  ;;  %v2828_v20 = vshll.u32 %v2772_v36, 16  ;;  %v5182_v45 = vld [vmem:[#allocation2 + $0x1c] sm:$0x1] }
 0x23e   : > { %v2788_v25 = vrot.slane %v2786_v31, 5  ;;  %v2853_v42 = vshrl.u32 %v2776_v63, 16  ;;  %v2856_v30 = vshll.u32 %v2776_v63, 16  ;;  %v2806_v32 = vshll.u32 %v5164_v39, 16  ;;  %v5189_v62 = vld [vmem:[#allocation2 + $0x2c] sm:$0x1] }
 0x23f   : > { %v2803_v40 = vor.u32 %v2802_v54, %v2799_v27  ;;  %v2839_v26 = vshrl.u32 %v2774_v3, 16  ;;  %v2842_v35 = vshll.u32 %v2774_v3, 16  ;;  %v2827_v49 = vrot.slane %v2825_v0, 4  ;;  %v4484_v18 = vld [vmem:[#allocation2 + $0x38] ss:$8 sps:$4 sm:$0xff]  }
 0x240   : > { %v2789_v56 = vor.u32 %v2788_v25, %v2785_v7  ;;  %v2858_v58 = vrot.slane %v2856_v30, 5  ;;  %v2808_v22 = vrot.slane %v2806_v32, 5  ;;  %v2884_v34 = vshll.u32 %v2780_v44, 16  ;;  %v2997_v32 = vld [vmem:[#allocation2 + $0x10] sm:$0xe] }
 0x241   : > { %4216 = vmatmul.mubr.msk.bf16.vlgmr.msra.gmra.mrb[0].mxu1 %vm2308_vm0, %v3909_v50  ;;  %v2921_v50 = vsel %vm2321_vm2, %v3942_v57, 0  ;;  %v2804_v33 = vrot.slane %v2803_v40, 4  ;;  %v2841_v28 = vrot.slane %v2839_v26, 4  ;;  %v2844_v38 = vrot.slane %v2842_v35, 5 }
 0x242   : > { %4224 = vmatpush3.bf16.msra.mxu1 %v2573_v53  ;;  %4219 = vmatprep.mubr.msk.bf16.mxu1 %vm2308_vm0, %v3910_v55  ;;  %v5167_v53 = vld [vmem:[#allocation2 + $0xc] sm:$0x1]  ;;  %v2811_v55 = vshrl.u32 %v2770_v8, 16  ;;  %v2790_v61 = vrot.slane %v2789_v56, 4  ;;  %v2867_v17 = vshrl.u32 %v2778_v14, 16  ;;  %v2870_v23 = vshll.u32 %v2778_v14, 16 }
 0x243   : > { %4433 = vmatprep.subr.msk.bf16.mxu1 %vm2321_vm2, %v3933_v43  ;;  %v2814_v43 = vshll.u32 %v2770_v8, 16  ;;  %v2792_v37 = vshll.u32 %v5167_v53, 16  ;;  %v2820_v2 = vshll.u32 %v5182_v45, 16  ;;  %v2845_v47 = vor.u32 %v2844_v38, %v2841_v28  ;;  %v2999_v14 = vld [vmem:[#allocation2 + $0x20] sm:$0xe] }
 0x244   : > { %v2813_v59 = vrot.slane %v2811_v55, 4  ;;  %v2848_v27 = vshll.u32 %v5189_v62, 16  ;;  %v2869_v7 = vrot.slane %v2867_v17, 4  ;;  %v2872_v25 = vrot.slane %v2870_v23, 5  ;;  %v5204_v55 = vld [vmem:[#allocation2 + $0x3c] sm:$0x1] }
 0x245   : > { %v2816_v60 = vrot.slane %v2814_v43, 5  ;;  %v2794_v4 = vrot.slane %v2792_v37, 5  ;;  %v2846_v8 = vrot.slane %v2845_v47, 4  ;;  %v2822_v3 = vrot.slane %v2820_v2, 5 }
 0x246   : > { %v2850_v30 = vrot.slane %v2848_v27, 5  ;;  %v3079_v35 = vsel %vm2321_vm2, %v5173_v13, 0  ;;  %v3038_v2 = vrot.slane %v5189_v62, 5 }
 0x247   : > { %v2817_v10 = vor.u32 %v2816_v60, %v2813_v59  ;;  %v2795_v46 = vsel %vm4657_vm11, %v2790_v61, %v2794_v4  ;;  %v3022_v61 = vrot.slane %v5167_v53, 5  ;;  %v2998_v4 = vld [vmem:[#allocation2 + $0x18] sm:$0xe] }
 0x248   : > { %v3953_v23 = vrot.slane %v2998_v4, 9 }
 0x249   : > { %4220 = vmatmul.mubr.msk.bf16.gmra.mrb[4].mxu1 %vm2308_vm0, %v3911_v19  ;;  %v2830_v19 = vrot.slane %v2828_v20, 5  ;;  %v2818_v36 = vrot.slane %v2817_v10, 4  ;;  %v5198_v20 = vld [vmem:[#allocation2 + $0x44] sm:$0x1]  ;;  %v3000_v10 = vld [vmem:[#allocation2 + $0x28] sm:$0xe] }
 0x24a   : > { %4225 = vmatprep.mubr.msk.bf16.mxu1 %vm2308_vm0, %v3925_v52  ;;  %v2855_v52 = vrot.slane %v2853_v42, 4  ;;  %v2890_v56 = vshll.u32 %v5198_v20, 16  ;;  %v3050_v62 = vrot.slane %v5198_v20, 5 }
 0x24b   : > { %v2831_v48 = vor.u32 %v2830_v19, %v2827_v49  ;;  %v2823_v43 = vsel %vm4657_vm11, %v2818_v36, %v2822_v3  ;;  %v2876_v19 = vshll.u32 %v5204_v55, 16 }
 0x24c   : > { %v2859_v15 = vor.u32 %v2858_v58, %v2855_v52  ;;  %v3968_v52 = vld [vmem:[%s5357_s3 + $0x18] sm:$0xf]  ;;  %v3952_v58 = vrot.slane %v2997_v32, 9  ;;  %v2892_v59 = vrot.slane %v2890_v56, 5  ;;  %v3280_v56 = vld [vmem:[#allocation2 + $0x30] sm:$0xf] }
 0x24d   : > { %v2832_v6 = vrot.slane %v2831_v48, 4  ;;  %v3001_v48 = vld [vmem:[#allocation2 + $0x30] sm:$0xe] }
 0x24e   : > { %v2860_v54 = vrot.slane %v2859_v15, 4  ;;  %v3034_v15 = vrot.slane %v5178_v9, 5 }
 0x251   : > { %4226 = vmatmul.mubr.msk.bf16.vlgmr.msra.gmra.mrb[0].mxu1 %vm2308_vm0, %v3926_v1  ;;  %v5184_v1 = vld [vmem:[#allocation2 + $0x34] sm:$0x1] }
 0x252   : > { %4234 = vmatpush3.bf16.msra.mxu1 %v2691_v51  ;;  %4229 = vmatprep.mubr.msk.bf16.mxu1 %vm2308_vm0, %v3927_v11  ;;  %v2881_v51 = vshrl.u32 %v2780_v44, 16  ;;  %v2809_v11 = vsel %vm4657_vm11, %v2804_v33, %v2808_v22  ;;  %v2862_v21 = vshll.u32 %v5184_v1, 16  ;;  %v2996_v33 = vld [vmem:[#allocation2 + $0x8] sm:$0xe]  ;;  %v3026_v44 = vrot.slane %v5164_v39, 5 }
 0x253   : > { %4434 = vmatprep.subr.msk.bf16.mxu1 %vm2321_vm2, %v3942_v57  ;;  %v2834_v57 = vshll.u32 %v5178_v9, 16  ;;  %v3951_v60 = vrot.slane %v2996_v33, 9  ;;  %v2878_v22 = vrot.slane %v2876_v19, 5  ;;  %v3042_v17 = vrot.slane %v5184_v1, 5 }
 0x254   : > { %v2883_v31 = vrot.slane %v2881_v51, 4  ;;  %v2864_v0 = vrot.slane %v2862_v21, 5  ;;  %v3027_v38 = vsel %vm4734_vm15, %v3952_v58, %v3026_v44  ;;  %v3003_v21 = vld [vmem:[#allocation2 + $0x40] sm:$0xe]  ;;  %v3197_v1 = vsel %vm2321_vm2, %v3968_v52, 0 }
 0x255   : > { %v2836_v63 = vrot.slane %v2834_v57, 5  ;;  %v3956_v57 = vrot.slane %v3001_v48, 9  ;;  %v3958_v27 = vrot.slane %v3003_v21, 9  ;;  %v3348_v58 = vshll.u32 %v3280_v56, 16  ;;  %v3286_v44 = vld [vmem:[#allocation2 + $0x48] sm:$0xf] }
 0x256   : > { %v4487_v48 = vld [vmem:[#allocation2 + $0x30] ss:$8 sps:$4 sm:$0xff]  }
 0x257   : > { %v2837_v40 = vsel %vm4657_vm11, %v2832_v6, %v2836_v63  ;;  %v3043_v9 = vsel %vm4734_vm15, %v3956_v57, %v3042_v17  ;;  %v3046_v63 = vrot.slane %v5204_v55, 5  ;;  %v3284_v57 = vld [vmem:[#allocation2 + $0x40] sm:$0xf] }
 0x258   : > { %v3944_v26 = vcombine.low %v2823_v43, %v2837_v40 }
 0x259   : > { %4230 = vmatmul.mubr.msk.bf16.gmra.mrb[4].mxu1 %vm2308_vm0, %v3928_v24  ;;  %v3943_v24 = vcombine.low %v2795_v46, %v2809_v11  ;;  %v3954_v11 = vrot.slane %v2999_v14, 9  ;;  %v3955_v46 = vrot.slane %v3000_v10, 9  ;;  %v3350_v10 = vrot.slane %v3348_v58, 5 }
 0x25a   : > { %4235 = vmatprep.mubr.msk.bf16.mxu1 %vm2308_vm0, %v4481_v41  ;;  %v2886_v41 = vrot.slane %v2884_v34, 5  ;;  %v3023_v34 = vsel %vm4734_vm15, %v3951_v60, %v3022_v61 }
 0x25b   : > { %v3960_v53 = vcombine.low %v3023_v34, %v3027_v38  ;;  %v3035_v47 = vsel %vm4734_vm15, %v3954_v11, %v3034_v15 }
 0x25c   : > { %v2887_v42 = vor.u32 %v2886_v41, %v2883_v31  ;;  %v3039_v31 = vsel %vm4734_vm15, %v3955_v46, %v3038_v2  ;;  %v3390_v46 = vshll.u32 %v3286_v44, 16 }
 0x25d   : > { %v3962_v41 = vcombine.low %v3039_v31, %v3043_v9  ;;  %v5275_v9 = vld [vmem:[#allocation2 + $0x2c] sm:$0x1]  ;;  %v5279_v31 = vld [vmem:[#allocation2 + $0x34] sm:$0x1] }
 0x25e   : > { %v2888_v37 = vrot.slane %v2887_v42, 4  ;;  %v3544_v29 = vrot.slane %v5279_v31, 5 }
 0x260   : > { %v2893_v28 = vsel %vm4657_vm11, %v2888_v37, %v2892_v59  ;;  %v3282_v37 = vld [vmem:[#allocation2 + $0x38] sm:$0xf]  ;;  %v5262_v59 = vld [vmem:[#allocation2 + $0x1c] sm:$0x1] }
 0x261   : > { %4236 = vmatmul.mubr.msk.bf16.vlgmr.msra.gmra.mrb[0].mxu1 %vm2308_vm0, %v4482_v5  ;;  %v2873_v5 = vor.u32 %v2872_v25, %v2869_v7  ;;  %v3272_v7 = vld [vmem:[#allocation2 + $0x10] sm:$0xf]  ;;  %v3051_v25 = vsel %vm4734_vm15, %v3958_v27, %v3050_v62  ;;  %v3359_v14 = vshrl.u32 %v3282_v37, 16  ;;  %v3312_v11 = vshll.u32 %v5262_v59, 16 }
 0x262   : > { %4244 = vmatpush3.bf16.msra.mxu1 %v2921_v50  ;;  %4239 = vmatprep.mubr.msk.bf16.mxu1 %vm2308_vm0, %v4483_v12  ;;  %v2865_v50 = vsel %vm4657_vm11, %v2860_v54, %v2864_v0  ;;  %v2851_v12 = vsel %vm4657_vm11, %v2846_v8, %v2850_v30  ;;  %v3977_v54 = vld [vmem:[%s5357_s3 + $0x1c] sm:$0xf]  ;;  %v3274_v8 = vld [vmem:[#allocation2 + $0x18] sm:$0xf]  ;;  %v3289_v0 = vshrl.u32 %v3272_v7, 16  ;;  %v3292_v20 = vshll.u32 %v3272_v7, 16 }
 0x263   : > { %4435 = vmatprep.subr.msk.bf16.mxu1 %vm2321_vm2, %v5173_v13  ;;  %v3945_v49 = vcombine.low %v2851_v12, %v2865_v50  ;;  %v2874_v13 = vrot.slane %v2873_v5, 4  ;;  %v3303_v42 = vshrl.u32 %v3274_v8, 16  ;;  %v3306_v30 = vshll.u32 %v3274_v8, 16  ;;  %v4485_v50 = vld [vmem:[#allocation2 + $0x10] ss:$8 sps:$4 sm:$0xff]  }
 0x264   : > { %v3291_v43 = vrot.slane %v3289_v0, 4  ;;  %v3294_v55 = vrot.slane %v3292_v20, 5  ;;  %v3278_v5 = vld [vmem:[#allocation2 + $0x28] sm:$0xf]  ;;  %v5259_v12 = vld [vmem:[#allocation2 + $0x14] sm:$0x1] }
 0x265   : > { %v2879_v39 = vsel %vm4657_vm11, %v2874_v13, %v2878_v22  ;;  %v3305_v32 = vrot.slane %v3303_v42, 4  ;;  %v3334_v19 = vshll.u32 %v3278_v5, 16  ;;  %v3427_v13 = vsel %vm2321_vm2, %v3977_v54, 0  ;;  %v4486_v22 = vld [vmem:[#allocation2 + $0x20] ss:$8 sps:$4 sm:$0xff]  }
 0x266   : > { %v3946_v51 = vcombine.low %v2879_v39, %v2893_v28  ;;  %v3295_v33 = vor.u32 %v3294_v55, %v3291_v43  ;;  %v3298_v28 = vshll.u32 %v5259_v12, 16  ;;  %v3362_v39 = vshll.u32 %v3282_v37, 16  ;;  %v5284_v7 = vld [vmem:[#allocation2 + $0x3c] sm:$0x1]  ;;  %v4488_v0 = vld [vmem:[#allocation2 + $0x40] ss:$8 sps:$4 sm:$0xff]  }
 0x267   : > { %v3336_v4 = vrot.slane %v3334_v19, 5  ;;  %v3361_v21 = vrot.slane %v3359_v14, 4  ;;  %v3314_v62 = vrot.slane %v3312_v11, 5  ;;  %v3392_v8 = vrot.slane %v3390_v46, 5  ;;  %v5293_v19 = vld [vmem:[#allocation2 + $0x44] sm:$0x1] }
 0x268   : > { %v3300_v2 = vrot.slane %v3298_v28, 5  ;;  %v5295_v37 = vld [vmem:[#allocation2 + $0x4c] sm:$0x1]  ;;  %v3382_v28 = vshll.u32 %v5293_v19, 16 }
 0x269   : > { %4240 = vmatmul.mubr.msk.bf16.gmra.mrb[4].mxu1 %vm2308_vm0, %v4484_v18  ;;  %v3030_v18 = vrot.slane %v5182_v45, 5  ;;  %v3002_v45 = vld [vmem:[#allocation2 + $0x38] sm:$0xe] }
 0x26a   : > { %4245 = vmatprep.mubr.msk.bf16.mxu1 %vm2308_vm0, %v3943_v24  ;;  %v3957_v36 = vrot.slane %v3002_v45, 9  ;;  %v3373_v45 = vshrl.u32 %v3284_v57, 16 }
 0x26b   : > { %v3031_v24 = vsel %vm4734_vm15, %v3953_v23, %v3030_v18  ;;  %v3387_v18 = vshrl.u32 %v3286_v44, 16 }
 0x26c   : > { %v3961_v6 = vcombine.low %v3031_v24, %v3035_v47  ;;  %v3047_v3 = vsel %vm4734_vm15, %v3957_v36, %v3046_v63  ;;  %v3364_v24 = vrot.slane %v3362_v39, 5  ;;  %v3340_v63 = vshll.u32 %v5275_v9, 16 }
 0x26d   : > { %v3963_v40 = vcombine.low %v3047_v3, %v3051_v25  ;;  %v3389_v25 = vrot.slane %v3387_v18, 4  ;;  %v3375_v43 = vrot.slane %v3373_v45, 4 }
 0x26e   : > { %v3365_v42 = vor.u32 %v3364_v24, %v3361_v21  ;;  %v3506_v21 = vld [vmem:[#allocation2 + $0x30] sm:$0xe] }
 0x271   : > { %4246 = vmatmul.mubr.msk.bf16.vlgmr.msra.gmra.mrb[0].mxu1 %vm2308_vm0, %v3944_v26  ;;  %v3308_v26 = vrot.slane %v3306_v30, 5 }
 0x272   : > { %4254 = vmatpush3.bf16.msra.mxu1 %v3079_v35  ;;  %4249 = vmatprep.mubr.msk.bf16.mxu1 %vm2308_vm0, %v3945_v49  ;;  %v3276_v35 = vld [vmem:[#allocation2 + $0x20] sm:$0xf]  ;;  %v3331_v49 = vshrl.u32 %v3278_v5, 16 }
 0x273   : > { %4436 = vmatprep.subr.msk.bf16.mxu1 %vm2321_vm2, %v3968_v52  ;;  %v3345_v52 = vshrl.u32 %v3280_v56, 16  ;;  %v3317_v60 = vshrl.u32 %v3276_v35, 16  ;;  %v3320_v61 = vshll.u32 %v3276_v35, 16  ;;  %v3309_v38 = vor.u32 %v3308_v26, %v3305_v32 }
 0x274   : > { %v3333_v34 = vrot.slane %v3331_v49, 4  ;;  %v3368_v56 = vshll.u32 %v5284_v7, 16  ;;  %v3342_v26 = vrot.slane %v3340_v63, 5  ;;  %v3366_v49 = vrot.slane %v3365_v42, 4 }
 0x275   : > { %v3347_v15 = vrot.slane %v3345_v52, 4  ;;  %v3319_v17 = vrot.slane %v3317_v60, 4  ;;  %v3322_v23 = vrot.slane %v3320_v61, 5  ;;  %v3310_v47 = vrot.slane %v3309_v38, 4  ;;  %v3502_v38 = vld [vmem:[#allocation2 + $0x10] sm:$0xe] }
 0x276   : > { %v3370_v61 = vrot.slane %v3368_v56, 5  ;;  %v4003_v56 = vld [vmem:[%s5358_s4] ss:$0 sm:$0xff] }
 0x277   : > { %v3323_v36 = vor.u32 %v3322_v23, %v3319_v17  ;;  %v3315_v20 = vsel %vm4657_vm11, %v3310_v47, %v3314_v62  ;;  %v3384_v17 = vrot.slane %v3382_v28, 5  ;;  %v3505_v47 = vld [vmem:[#allocation2 + $0x28] sm:$0xe]  ;;  %v3990_v62 = vrot.slane %v3506_v21, 9 }
 0x279   : > { %4250 = vmatmul.mubr.msk.bf16.gmra.mrb[4].mxu1 %vm2308_vm0, %v3946_v51  ;;  %v5268_v51 = vld [vmem:[%s5357_s3 + $0x20] sm:$0xf]  ;;  %v3324_v32 = vrot.slane %v3323_v36, 4 }
 0x27a   : > { %4255 = vmatprep.mubr.msk.bf16.mxu1 %vm2308_vm0, %v3960_v53  ;;  %v3296_v53 = vrot.slane %v3295_v33, 4  ;;  %v3393_v33 = vor.u32 %v3392_v8, %v3389_v25  ;;  %v3585_v39 = vsel %vm2321_vm2, %v5268_v51, 0  ;;  %v3548_v25 = vrot.slane %v5284_v7, 5 }
 0x27b   : > { %v3552_v7 = vrot.slane %v5293_v19, 5 }
 0x27c   : > { %v3301_v27 = vsel %vm4657_vm11, %v3296_v53, %v3300_v2  ;;  %v3394_v53 = vrot.slane %v3393_v33, 4 }
 0x27d   : > { %v3978_v30 = vcombine.low %v3301_v27, %v3315_v20  ;;  %v3507_v27 = vld [vmem:[#allocation2 + $0x38] sm:$0xe]  ;;  %v3508_v20 = vld [vmem:[#allocation2 + $0x40] sm:$0xe] }
 0x27e   : > { %v3991_v63 = vrot.slane %v3507_v27, 9 }
 0x281   : > { %4256 = vmatmul.mubr.msk.bf16.vlgmr.msra.gmra.mrb[0].mxu1 %vm2308_vm0, %v3961_v6  ;;  %v5277_v6 = vld [vmem:[#allocation2 + $0x24] sm:$0x1] }
 0x282   : > { %4264 = vmatpush3.bf16.msra.mxu1 %v3197_v1  ;;  %4259 = vmatprep.mubr.msk.bf16.mxu1 %vm2308_vm0, %v3962_v41  ;;  %v3337_v1 = vor.u32 %v3336_v4, %v3333_v34  ;;  %v3376_v41 = vshll.u32 %v3284_v57, 16  ;;  %v3326_v3 = vshll.u32 %v5277_v6, 16  ;;  %v3528_v57 = vrot.slane %v5259_v12, 5 }
 0x283   : > { %4437 = vmatprep.subr.msk.bf16.mxu1 %vm2321_vm2, %v3977_v54  ;;  %v3351_v54 = vor.u32 %v3350_v10, %v3347_v15  ;;  %v3503_v15 = vld [vmem:[#allocation2 + $0x18] sm:$0xe]  ;;  %v3986_v10 = vrot.slane %v3502_v38, 9  ;;  %v3536_v36 = vrot.slane %v5277_v6, 5 }
 0x284   : > { %v3378_v55 = vrot.slane %v3376_v41, 5  ;;  %v3328_v52 = vrot.slane %v3326_v3, 5  ;;  %v3987_v23 = vrot.slane %v3503_v15, 9  ;;  %v3989_v41 = vrot.slane %v3505_v47, 9 }
 0x285   : > { %v3352_v5 = vrot.slane %v3351_v54, 4  ;;  %v3529_v2 = vsel %vm4734_vm15, %v3986_v10, %v3528_v57 }
 0x286   : > { %v3379_v44 = vor.u32 %v3378_v55, %v3375_v43 }
 0x288   : > { %v3380_v4 = vrot.slane %v3379_v44, 4 }
 0x289   : > { %4260 = vmatmul.mubr.msk.bf16.gmra.mrb[4].mxu1 %vm2308_vm0, %v3963_v40  ;;  %v3354_v40 = vshll.u32 %v5279_v31, 16 }
 0x28a   : > { %4265 = vmatprep.mubr.msk.bf16.mxu1 %vm2308_vm0, %v4485_v50  ;;  %v3338_v50 = vrot.slane %v3337_v1, 4  ;;  %v3385_v18 = vsel %vm4657_vm11, %v3380_v4, %v3384_v17  ;;  %v3504_v1 = vld [vmem:[#allocation2 + $0x20] sm:$0xe] }
 0x28b   : > { %v3356_v35 = vrot.slane %v3354_v40, 5  ;;  %v3988_v54 = vrot.slane %v3504_v1, 9  ;;  %v3549_v40 = vsel %vm4734_vm15, %v3991_v63, %v3548_v25 }
 0x28c   : > { %v3343_v58 = vsel %vm4657_vm11, %v3338_v50, %v3342_v26  ;;  %v3556_v50 = vrot.slane %v5295_v37, 5 }
 0x28d   : > { %v3357_v60 = vsel %vm4657_vm11, %v3352_v5, %v3356_v35  ;;  %v3537_v3 = vsel %vm4734_vm15, %v3988_v54, %v3536_v36 }
 0x291   : > { %4266 = vmatmul.mubr.msk.bf16.vlgmr.msra.gmra.mrb[0].mxu1 %vm2308_vm0, %v4486_v22  ;;  %v3329_v22 = vsel %vm4657_vm11, %v3324_v32, %v3328_v52 }
 0x292   : > { %4274 = vmatpush3.bf16.msra.mxu1 %v3427_v13  ;;  %4269 = vmatprep.mubr.msk.bf16.mxu1 %vm2308_vm0, %v4487_v48  ;;  %v3396_v13 = vshll.u32 %v5295_v37, 16  ;;  %v3979_v14 = vcombine.low %v3329_v22, %v3343_v58  ;;  %v3371_v48 = vsel %vm4657_vm11, %v3366_v49, %v3370_v61 }
 0x293   : > { %4438 = vmatprep.subr.msk.bf16.mxu1 %vm2321_vm2, %v5268_v51  ;;  %v3980_v34 = vcombine.low %v3357_v60, %v3371_v48  ;;  %v3532_v51 = vrot.slane %v5262_v59, 5  ;;  %v3540_v59 = vrot.slane %v5275_v9, 5  ;;  %v3545_v9 = vsel %vm4734_vm15, %v3990_v62, %v3544_v29 }
 0x294   : > { %v3398_v11 = vrot.slane %v3396_v13, 5  ;;  %v3997_v6 = vcombine.low %v3545_v9, %v3549_v40 }
 0x295   : > { %v3533_v12 = vsel %vm4734_vm15, %v3987_v23, %v3532_v51  ;;  %v3541_v8 = vsel %vm4734_vm15, %v3989_v41, %v3540_v59 }
 0x296   : > { %v3399_v46 = vsel %vm4657_vm11, %v3394_v53, %v3398_v11  ;;  %v3995_v45 = vcombine.low %v3529_v2, %v3533_v12  ;;  %v3996_v31 = vcombine.low %v3537_v3, %v3541_v8 }
 0x297   : > { %v3981_v24 = vcombine.low %v3385_v18, %v3399_v46 }
 0x299   : > { %4270 = vmatmul.mubr.msk.bf16.gmra.mrb[4].mxu1 %vm2308_vm0, %v4488_v0  ;;  %v3509_v0 = vld [vmem:[#allocation2 + $0x48] sm:$0xe] }
 0x29a   : > { %4275 = vmatprep.mubr.msk.bf16.mxu1 %vm2308_vm0, %v3978_v30  ;;  %v3993_v42 = vrot.slane %v3509_v0, 9  ;;  %v3992_v30 = vrot.slane %v3508_v20, 9 }
 0x29c   : > { %v3553_v43 = vsel %vm4734_vm15, %v3992_v30, %v3552_v7  ;;  %v3557_v55 = vsel %vm4734_vm15, %v3993_v42, %v3556_v50 }
 0x29d   : > { %v3998_v5 = vcombine.low %v3553_v43, %v3557_v55 }
 0x2a1   : > { %4276 = vmatmul.mubr.msk.bf16.vlgmr.msra.gmra.mrb[0].mxu1 %vm2308_vm0, %v3979_v14 }
 0x2a2   : > { %4284 = vmatpush3.bf16.msra.mxu1 %v3585_v39  ;;  %4279 = vmatprep.mubr.msk.bf16.mxu1 %vm2308_vm0, %v3980_v34 }
 0x2a9   : > { %4280 = vmatmul.mubr.msk.bf16.gmra.mrb[4].mxu1 %vm2308_vm0, %v3981_v24 }
 0x2aa   : > { %4285 = vmatprep.mubr.msk.bf16.mxu1 %vm2308_vm0, %v3995_v45 }
 0x2b1   : > { %4286 = vmatmul.mubr.msk.bf16.vlgmr.msra.gmra.mrb[0].mxu1 %vm2308_vm0, %v3996_v31 }
 0x2b2   : > { %4289 = vmatprep.mubr.msk.bf16.mxu1 %vm2308_vm0, %v3997_v6 }
 0x2b9   : > { %4290 = vmatmul.mubr.msk.bf16.gmra.mrb[4].mxu1 %vm2308_vm0, %v3998_v5 }
 0x384   : > { %v4287_v32 = vpop.f32.mrb[0].mxu1 }
 0x385   : > { %v3621_v26 = vpop.f32.mrb[1].mxu1  ;;  %v3669_v52 = vadd.f32 %v4287_v32, %v4003_v56 }
 0x386   : > { %v3667_v35 = vadd.f32 %v4003_v56, %v3621_v26  ;;  %v4288_v49 = vpop.f32.mrb[2].mxu1 }
 0x387   : > { %v3624_v19 = vpop.f32.mrb[3].mxu1  ;;  %v3677_v61 = vmax.f32 %v3669_v52, 0.0  ;;  %v3670_v22 = vadd.f32 %v4288_v49, %v4003_v56 }
 0x388   : > { %v3675_v37 = vmax.f32 %v3667_v35, 0.0  ;;  %v3668_v33 = vadd.f32 %v4003_v56, %v3624_v19 }
 0x389   : > { %v3678_v28 = vmax.f32 %v3670_v22, 0.0 }
 0x38a   : > { %3683 = vxpose.xlu1.b32.start [1/8] (short) (narrow) %v3675_v37, 8  ;;  %v3676_v58 = vmax.f32 %v3668_v33, 0.0 }
 0x38c   : > { %v4291_v44 = vpop.f32.mrb[4].mxu1 }
 0x38d   : > { %v3637_v16 = vpop.f32.mrb[5].mxu1  ;;  %v3673_v48 = vadd.f32 %v4291_v44, %v4003_v56 }
 0x38e   : > { %3684 = vxpose.xlu1.b32.cont [2/8] (short) (narrow) %v3676_v58, 8  ;;  %v4292_v13 = vpop.f32.mrb[6].mxu1  ;;  %v3671_v38 = vadd.f32 %v4003_v56, %v3637_v16 }
 0x38f   : > { %v3640_v60 = vpop.f32.mrb[7].mxu1  ;;  %v3681_v4 = vmax.f32 %v3673_v48, 0.0  ;;  %v3674_v53 = vadd.f32 %v4292_v13, %v4003_v56 }
 0x390   : > { %v3679_v14 = vmax.f32 %v3671_v38, 0.0  ;;  %v3672_v39 = vadd.f32 %v4003_v56, %v3640_v60 }
 0x391   : > { %v3682_v11 = vmax.f32 %v3674_v53, 0.0 }
 0x392   : > { %3685 = vxpose.xlu1.b32.cont [3/8] (short) (narrow) %v3677_v61, 8  ;;  %v3680_v34 = vmax.f32 %v3672_v39, 0.0 }
 0x396   : > { %3686 = vxpose.xlu1.b32.cont [4/8] (short) (narrow) %v3678_v28, 8 }
 0x39a   : > { %3687 = vxpose.xlu1.b32.cont [5/8] (short) (narrow) %v3679_v14, 8 }
 0x39e   : > { %3688 = vxpose.xlu1.b32.cont [6/8] (short) (narrow) %v3680_v34, 8 }
 0x3a2   : > { %3689 = vxpose.xlu1.b32.cont [7/8] (short) (narrow) %v3681_v4, 8 }
 0x3a6   : > { %3690 = vxpose.xlu1.b32.end [8/8] (short) (narrow) %v3682_v11, 8 }
 0x40a   : > { %v3699_v15 = vpop.trf.xlu1 }
 0x40b   : > { %3716 = vst.msk [vmem:[%s222_s23] sm:$0xff] %vm3715_vm1, %v3699_v15 }
 0x40c PF: > { %s15_s18 = sadd.s32 1, %s4495_s18  }
 0x40d   : > { %p12_p4 = scmp.ge.s32.totalorder %s15_s18, 4  }
 0x40f   :  { %14 = sbr.rel (!%p12_p4) target bundleno = 1 (0x1), region = 88 }

</bundles_post_ra>
